<compile_context>
chip_gen: v7x
topology: tpu7x:2x2x1
jax: 0.10.0
libtpu: 0.0.40
codegen_flags: <defaults>
</compile_context>

<pallas_src>
import jax
import jax.numpy as jnp
import numpy as np
from jax import lax
from jax.experimental import pallas as pl
from jax.experimental.pallas import tpu as pltpu


def _resblock_kernel(x_ref, w1_ref, w2_ref, sb1_ref, sb2_ref, out_ref, rc_ref):
    # x_ref  : (H, W, C)       full-image NHWC input (resident per batch step)
    # w1_ref : (3, 3*C, C)     conv1 weights, layout [kh, kw*Cin + cin, cout]
    # w2_ref : (3, 3*C, C)     conv2 weights, same layout
    # sb1_ref: (2, C)  f32     row 0 = scale1, row 1 = bias1 (folded BN1)
    # sb2_ref: (2, C)  f32     row 0 = scale2, row 1 = bias2 (folded BN2)
    # out_ref: (TH, W, C)      one row band of the output
    # rc_ref : (TH+4, W, 3*C)  row-banded im2col scratch, reused by both convs
    H, W, C = x_ref.shape
    TH = out_ref.shape[0]
    st = rc_ref.dtype

    r = pl.program_id(1)                      # row-band index
    nr = pl.num_programs(1)
    r0 = pl.multiple_of(r * TH, TH)           # first output row of this band

    def put_bands(dst_row, nrows, v):
        # v: (nrows, W, C).  Writes the 3 kw-shifted im2col bands; the 1-col
        # zero halo is folded into the shifted copies (no strip stores, no
        # padded scratch, no band re-loads).
        v = v.astype(st)
        zc = jnp.zeros((nrows, 1, C), st)
        vp = jnp.concatenate([zc, v, zc], axis=1)            # (nrows, W+2, C)
        for kw in range(3):
            rc_ref[dst_row:dst_row + nrows, :, kw * C:(kw + 1) * C] = (
                vp[:, kw:kw + W, :])

    # ---- Stage conv1's input rows: band + 2-row halo each side (conv1 also
    # produces conv2's 1-row halo).  rc row p holds image row (r0 - 2 + p). --
    put_bands(2, TH, x_ref[pl.ds(r0, TH), :, :])

    @pl.when(r == 0)
    def _():                                   # top of image: zero halo rows
        rc_ref[0:2, :, :] = jnp.zeros((2, W, 3 * C), st)

    @pl.when(r > 0)
    def _():
        put_bands(0, 2, x_ref[pl.ds(r0 - 2, 2), :, :])

    @pl.when(r == nr - 1)
    def _():                                   # bottom of image
        rc_ref[TH + 2:TH + 4, :, :] = jnp.zeros((2, W, 3 * C), st)

    @pl.when(r < nr - 1)
    def _():
        put_bands(TH + 2, 2, x_ref[pl.ds(r0 + TH, 2), :, :])

    def conv_taps(w_ref, nrows):
        # Row-banded 3x3 conv: 3 matmuls with K = 3*C.  Per-tap *ref* slices
        # keep only one (nrows, W, 3C) slab live in vregs at a time.
        acc = None
        for kh in range(3):
            slab = rc_ref[kh:kh + nrows, :, :].reshape(nrows * W, 3 * C)
            part = jnp.dot(slab, w_ref[kh],
                           preferred_element_type=jnp.float32)
            acc = part if acc is None else acc + part   # init with first tap
        return acc                                      # (nrows*W, C) float32

    # ---- conv1 -> folded BN1 -> ReLU over TH+2 rows (band + conv2 halo). ---
    s1 = sb1_ref[0:1, :]
    b1 = sb1_ref[1:2, :]
    y = jnp.maximum(conv_taps(w1_ref, TH + 2) * s1 + b1, 0.0)

    # ---- conv2's im2col bands written straight from y (no padded scratch,
    # no extra staging pass).  Reuses rc rows [0, TH+2). ----
    put_bands(0, TH + 2, y.reshape(TH + 2, W, C))

    # conv2's zero padding at the image top/bottom edge: the halo row of y
    # lying outside the image must be zero (it was computed from zero-padded
    # x, which is not the same thing).
    @pl.when(r == 0)
    def _():
        rc_ref[0:1, :, :] = jnp.zeros((1, W, 3 * C), st)

    @pl.when(r == nr - 1)
    def _():
        rc_ref[TH + 1:TH + 2, :, :] = jnp.zeros((1, W, 3 * C), st)

    # ---- conv2 -> folded BN2 -> + identity -> ReLU over the TH band rows. --
    s2 = sb2_ref[0:1, :]
    b2 = sb2_ref[1:2, :]
    z = conv_taps(w2_ref, TH) * s2 + b2
    z = z + x_ref[pl.ds(r0, TH), :, :].astype(jnp.float32).reshape(TH * W, C)
    out_ref[...] = jnp.maximum(z, 0.0).reshape(TH, W, C).astype(out_ref.dtype)


def _padded_vmem_bytes(shape, dtype):
    """Upper-bound VMEM footprint of one buffer (lane 128 / sublane 8 pad)."""
    s = list(shape) if shape else [1]
    s[-1] = -(-s[-1] // 128) * 128
    if len(s) >= 2:
        s[-2] = -(-s[-2] // 8) * 8
    n = 1
    for d in s:
        n *= int(d)
    return n * np.dtype(dtype).itemsize


def _pick_row_band(h):
    if h % 16 == 0 and h >= 64:
        return 16
    if h % 8 == 0 and h >= 16:
        return 8
    return h


def resblock_pallas(x_nchw, w1, w2, bn1, bn2, eps=1e-5,
                    io_dtype=jnp.float32, staging_dtype=None, row_band=None):
    """Fused ResBlock forward (eval-mode BN), stride=1, no downsample.

    x_nchw: (N, Cin, H, W).  w1: (Cout, Cin, 3, 3), w2: (Cout, Cout, 3, 3).
    bn1/bn2: dicts with 'gamma', 'beta', 'mean', 'var' of shape (Cout,).
    io_dtype:      dtype of HBM inputs/outputs (bf16 halves DMA traffic).
    staging_dtype: dtype of the weights + im2col scratch fed to the MXU; bf16
                   runs the MXU at native rate and halves VMEM copy passes
                   even with f32 I/O.  Accumulation / BN / ReLU stay f32.
    """
    N, Cin, H, W = x_nchw.shape
    Cout = w1.shape[0]
    assert Cin == Cout, "downsample=None requires in_channel == out_channel"
    if staging_dtype is None:
        staging_dtype = io_dtype
    if row_band is None:
        row_band = _pick_row_band(H)
    assert H % row_band == 0, "row band must divide H"
    TH = row_band
    n_bands = H // TH

    # NCHW -> NHWC (one layout pass; a model kept NHWC end-to-end avoids it).
    x = jnp.transpose(x_nchw, (0, 2, 3, 1)).astype(io_dtype)

    # (Cout, Cin, 3, 3) -> (kh, kw*Cin + cin, Cout) for the row-banded im2col.
    def prep_w(w):
        cout, cin = w.shape[0], w.shape[1]
        return (jnp.transpose(w, (2, 3, 1, 0))
                .reshape(3, 3 * cin, cout).astype(staging_dtype))

    w1r = prep_w(w1)
    w2r = prep_w(w2)

    def fold_bn(bn):
        scale = bn["gamma"] / jnp.sqrt(bn["var"] + eps)
        bias = bn["beta"] - bn["mean"] * scale
        return jnp.stack([scale, bias], axis=0).astype(jnp.float32)  # (2, C)

    sb1 = fold_bn(bn1)
    sb2 = fold_bn(bn2)

    # VMEM budget from the actual (tile-padded) buffers: double-buffered
    # in/out blocks + resident weights/BN + im2col scratch + headroom.
    vmem_need = (
        2 * _padded_vmem_bytes((H, W, Cin), io_dtype)              # x block
        + 2 * _padded_vmem_bytes((TH, W, Cout), io_dtype)          # out block
        + 2 * _padded_vmem_bytes((3, 3 * Cin, Cout), staging_dtype)
        + 2 * _padded_vmem_bytes((3, 3 * Cout, Cout), staging_dtype)
        + 4 * _padded_vmem_bytes((2, Cout), jnp.float32)
        + _padded_vmem_bytes((TH + 4, W, 3 * Cout), staging_dtype))
    # Floor at the v5e default (16 MiB), cap below v7x's 64 MiB physical VMEM
    # per TensorCore (v5e/v6e have 128 MiB).
    vmem_limit = int(min(max(2 * vmem_need + (2 << 20), 16 << 20), 56 << 20))

    out_nhwc = pl.pallas_call(
        _resblock_kernel,
        out_shape=jax.ShapeDtypeStruct((N, H, W, Cout), io_dtype),
        grid_spec=pltpu.PrefetchScalarGridSpec(
            num_scalar_prefetch=0,
            grid=(N, n_bands),
            in_specs=[
                # Full image per batch step, resident across the band axis.
                pl.BlockSpec((None, H, W, Cin), lambda n, r: (n, 0, 0, 0)),
                pl.BlockSpec((3, 3 * Cin, Cout), lambda n, r: (0, 0, 0)),
                pl.BlockSpec((3, 3 * Cout, Cout), lambda n, r: (0, 0, 0)),
                pl.BlockSpec((2, Cout), lambda n, r: (0, 0)),
                pl.BlockSpec((2, Cout), lambda n, r: (0, 0)),
            ],
            out_specs=pl.BlockSpec((None, TH, W, Cout),
                                   lambda n, r: (n, r, 0, 0)),
            scratch_shapes=[
                pltpu.VMEM((TH + 4, W, 3 * Cout), staging_dtype),
            ],
        ),
        compiler_params=pltpu.CompilerParams(
            dimension_semantics=("parallel", "parallel"),
            vmem_limit_bytes=vmem_limit,
        ),
    )(x, w1r, w2r, sb1, sb2)

    # NHWC -> NCHW for the PyTorch-style public interface.
    return jnp.transpose(out_nhwc, (0, 3, 1, 2))


def resblock_reference(x_nchw, w1, w2, bn1, bn2, eps=1e-5):
    """Pure-JAX reference matching PyTorch semantics (NCHW, eval-mode BN)."""
    def conv3x3(x, w):
        return lax.conv_general_dilated(
            x, w, window_strides=(1, 1), padding=((1, 1), (1, 1)),
            dimension_numbers=("NCHW", "OIHW", "NCHW"))

    def bn(x, p):
        scale = p["gamma"] / jnp.sqrt(p["var"] + eps)
        bias = p["beta"] - p["mean"] * scale
        return x * scale[None, :, None, None] + bias[None, :, None, None]

    out = conv3x3(x_nchw, w1)
    out = jnp.maximum(bn(out, bn1), 0.0)
    out = conv3x3(out, w2)
    out = bn(out, bn2)
    out = out + x_nchw
    return jnp.maximum(out, 0.0)


if __name__ == "__main__":
    key = jax.random.PRNGKey(0)
    N, C, H, W = 2, 4, 16, 16  # in_channel == out_channel == 4

    ks = jax.random.split(key, 8)
    x = jax.random.normal(ks[0], (N, C, H, W), jnp.float32)
    w1 = jax.random.normal(ks[1], (C, C, 3, 3), jnp.float32) * 0.1
    w2 = jax.random.normal(ks[2], (C, C, 3, 3), jnp.float32) * 0.1
    bn1 = {
        "gamma": 1.0 + 0.1 * jax.random.normal(ks[3], (C,), jnp.float32),
        "beta": 0.1 * jax.random.normal(ks[4], (C,), jnp.float32),
        "mean": 0.05 * jax.random.normal(ks[5], (C,), jnp.float32),
        "var": jnp.abs(1.0 + 0.1 * jax.random.normal(ks[6], (C,), jnp.float32)),
    }
    bn2 = {
        "gamma": 1.0 + 0.1 * jax.random.normal(ks[7], (C,), jnp.float32),
        "beta": jnp.linspace(-0.1, 0.1, C, dtype=jnp.float32),
        "mean": jnp.linspace(-0.05, 0.05, C, dtype=jnp.float32),
        "var": jnp.linspace(0.9, 1.1, C, dtype=jnp.float32),
    }

    ref = jax.block_until_ready(resblock_reference(x, w1, w2, bn1, bn2))

    # f32 I/O + f32 staging: exact parity with the eval-mode reference.
    out = jax.block_until_ready(resblock_pallas(x, w1, w2, bn1, bn2))
    assert out.shape == (N, C, H, W)
    err = jnp.max(jnp.abs(out - ref))
    assert jnp.allclose(out, ref, atol=1e-4, rtol=1e-4), f"max abs err {err}"

    # f32 I/O + bf16 MXU staging (recommended config on v5e/v6e/v7x):
    # accumulation stays f32, only input/weight/intermediate rounding remains.
    out_bf = resblock_pallas(x, w1, w2, bn1, bn2, staging_dtype=jnp.bfloat16)
    out_bf = jax.block_until_ready(out_bf).astype(jnp.float32)
    assert jnp.all(jnp.isfinite(out_bf))
    bf_err = jnp.max(jnp.abs(out_bf - ref))
    assert bf_err < 0.3, f"bf16-staging max abs err {bf_err}"

    print("KERNEL_OK")
</pallas_src>

<mosaic_0001>
module attributes {stable_mosaic.version = 11 : i64} {
  func.func @_resblock_kernel(%arg0: i32, %arg1: i32, %arg2: memref<1x16x16x4xf32, #tpu.memory_space<vmem>>, %arg3: memref<3x12x4xf32, #tpu.memory_space<vmem>>, %arg4: memref<3x12x4xf32, #tpu.memory_space<vmem>>, %arg5: memref<2x4xf32, #tpu.memory_space<vmem>>, %arg6: memref<2x4xf32, #tpu.memory_space<vmem>>, %arg7: memref<1x8x16x4xf32, #tpu.memory_space<vmem>>, %arg8: memref<12x16x12xf32, #tpu.memory_space<vmem>>) attributes {dimension_semantics = [#tpu.dimension_semantics<parallel>, #tpu.dimension_semantics<parallel>], iteration_bounds = array<i64: 2, 2>, scalar_prefetch = 0 : i64, scratch_operands = 1 : i64, tpu.core_type = #tpu.core_type<tc>, window_params = [{transform_indices = @transform_0, window_bounds = array<i64: 1, 16, 16, 4>}, {pipeline_mode = #tpu.pipeline_mode<synchronous>, transform_indices = @transform_1, window_bounds = array<i64: 3, 12, 4>}, {pipeline_mode = #tpu.pipeline_mode<synchronous>, transform_indices = @transform_2, window_bounds = array<i64: 3, 12, 4>}, {pipeline_mode = #tpu.pipeline_mode<synchronous>, transform_indices = @transform_3, window_bounds = array<i64: 2, 4>}, {pipeline_mode = #tpu.pipeline_mode<synchronous>, transform_indices = @transform_4, window_bounds = array<i64: 2, 4>}, {transform_indices = @transform_5, window_bounds = array<i64: 1, 8, 16, 4>}]} {
    %c8_i32 = arith.constant 8 : i32
    %0 = arith.muli %arg1, %c8_i32 : i32
    %1 = tpu.assume_multiple %0, 8 : i32
    %c0 = arith.constant 0 : index
    %2 = arith.index_cast %1 : i32 to index
    %c0_0 = arith.constant 0 : index
    %c0_1 = arith.constant 0 : index
    %3 = vector.load %arg2[%c0, %2, %c0_0, %c0_1] : memref<1x16x16x4xf32, #tpu.memory_space<vmem>>, vector<1x8x16x4xf32>
    %4 = vector.shape_cast %3 : vector<1x8x16x4xf32> to vector<8x16x4xf32>
    %cst = arith.constant 0.000000e+00 : f32
    %5 = vector.broadcast %cst : f32 to vector<8x1x4xf32>
    %6 = tpu.concatenate %5, %4, %5 in 1 : vector<8x1x4xf32>, vector<8x16x4xf32>, vector<8x1x4xf32> -> vector<8x18x4xf32>
    %7 = vector.extract_strided_slice %6 {offsets = [0, 0, 0], sizes = [8, 16, 4], strides = [1, 1, 1]} : vector<8x18x4xf32> to vector<8x16x4xf32>
    %c2 = arith.constant 2 : index
    %c0_2 = arith.constant 0 : index
    %c0_3 = arith.constant 0 : index
    %8 = vector.load %arg8[%c2, %c0_2, %c0_3] : memref<12x16x12xf32, #tpu.memory_space<vmem>>, vector<8x16x4xf32>
    tpu.vector_store %arg8[%c2, %c0_2, %c0_3], %7 {strides = array<i32>} : memref<12x16x12xf32, #tpu.memory_space<vmem>>, vector<8x16x4xf32>,
    %9 = vector.extract_strided_slice %6 {offsets = [0, 1, 0], sizes = [8, 16, 4], strides = [1, 1, 1]} : vector<8x18x4xf32> to vector<8x16x4xf32>
    %c2_4 = arith.constant 2 : index
    %c0_5 = arith.constant 0 : index
    %c4 = arith.constant 4 : index
    %10 = vector.load %arg8[%c2_4, %c0_5, %c4] : memref<12x16x12xf32, #tpu.memory_space<vmem>>, vector<8x16x4xf32>
    tpu.vector_store %arg8[%c2_4, %c0_5, %c4], %9 {strides = array<i32>} : memref<12x16x12xf32, #tpu.memory_space<vmem>>, vector<8x16x4xf32>,
    %11 = vector.extract_strided_slice %6 {offsets = [0, 2, 0], sizes = [8, 16, 4], strides = [1, 1, 1]} : vector<8x18x4xf32> to vector<8x16x4xf32>
    %c2_6 = arith.constant 2 : index
    %c0_7 = arith.constant 0 : index
    %c8 = arith.constant 8 : index
    %12 = vector.load %arg8[%c2_6, %c0_7, %c8] : memref<12x16x12xf32, #tpu.memory_space<vmem>>, vector<8x16x4xf32>
    tpu.vector_store %arg8[%c2_6, %c0_7, %c8], %11 {strides = array<i32>} : memref<12x16x12xf32, #tpu.memory_space<vmem>>, vector<8x16x4xf32>,
    %c0_i32 = arith.constant 0 : i32
    %13 = arith.cmpi eq, %arg1, %c0_i32 : i32
    %14 = arith.extui %13 : i1 to i32
    %c0_i32_8 = arith.constant 0 : i32
    %15 = arith.cmpi ne, %14, %c0_i32_8 : i32
    scf.if %15 {
      %cst_86 = arith.constant 0.000000e+00 : f32
      %99 = vector.broadcast %cst_86 : f32 to vector<2x16x12xf32>
      %c0_87 = arith.constant 0 : index
      %c0_88 = arith.constant 0 : index
      %c0_89 = arith.constant 0 : index
      %100 = vector.load %arg8[%c0_87, %c0_88, %c0_89] : memref<12x16x12xf32, #tpu.memory_space<vmem>>, vector<2x16x12xf32>
      tpu.vector_store %arg8[%c0_87, %c0_88, %c0_89], %99 {strides = array<i32>} : memref<12x16x12xf32, #tpu.memory_space<vmem>>, vector<2x16x12xf32>,
    } else {
    }
    %c0_i32_9 = arith.constant 0 : i32
    %16 = arith.cmpi sgt, %arg1, %c0_i32_9 : i32
    %17 = arith.extui %16 : i1 to i32
    %c0_i32_10 = arith.constant 0 : i32
    %18 = arith.cmpi ne, %17, %c0_i32_10 : i32
    scf.if %18 {
      %c2_i32 = arith.constant 2 : i32
      %99 = arith.subi %1, %c2_i32 : i32
      %c0_86 = arith.constant 0 : index
      %100 = arith.index_cast %99 : i32 to index
      %c0_87 = arith.constant 0 : index
      %c0_88 = arith.constant 0 : index
      %101 = vector.load %arg2[%c0_86, %100, %c0_87, %c0_88] : memref<1x16x16x4xf32, #tpu.memory_space<vmem>>, vector<1x2x16x4xf32>
      %102 = vector.shape_cast %101 : vector<1x2x16x4xf32> to vector<2x16x4xf32>
      %cst_89 = arith.constant 0.000000e+00 : f32
      %103 = vector.broadcast %cst_89 : f32 to vector<2x1x4xf32>
      %104 = tpu.concatenate %103, %102, %103 in 1 : vector<2x1x4xf32>, vector<2x16x4xf32>, vector<2x1x4xf32> -> vector<2x18x4xf32>
      %105 = vector.extract_strided_slice %104 {offsets = [0, 0, 0], sizes = [2, 16, 4], strides = [1, 1, 1]} : vector<2x18x4xf32> to vector<2x16x4xf32>
      %c0_90 = arith.constant 0 : index
      %c0_91 = arith.constant 0 : index
      %c0_92 = arith.constant 0 : index
      %106 = vector.load %arg8[%c0_90, %c0_91, %c0_92] : memref<12x16x12xf32, #tpu.memory_space<vmem>>, vector<2x16x4xf32>
      tpu.vector_store %arg8[%c0_90, %c0_91, %c0_92], %105 {strides = array<i32>} : memref<12x16x12xf32, #tpu.memory_space<vmem>>, vector<2x16x4xf32>,
      %107 = vector.extract_strided_slice %104 {offsets = [0, 1, 0], sizes = [2, 16, 4], strides = [1, 1, 1]} : vector<2x18x4xf32> to vector<2x16x4xf32>
      %c0_93 = arith.constant 0 : index
      %c0_94 = arith.constant 0 : index
      %c4_95 = arith.constant 4 : index
      %108 = vector.load %arg8[%c0_93, %c0_94, %c4_95] : memref<12x16x12xf32, #tpu.memory_space<vmem>>, vector<2x16x4xf32>
      tpu.vector_store %arg8[%c0_93, %c0_94, %c4_95], %107 {strides = array<i32>} : memref<12x16x12xf32, #tpu.memory_space<vmem>>, vector<2x16x4xf32>,
      %109 = vector.extract_strided_slice %104 {offsets = [0, 2, 0], sizes = [2, 16, 4], strides = [1, 1, 1]} : vector<2x18x4xf32> to vector<2x16x4xf32>
      %c0_96 = arith.constant 0 : index
      %c0_97 = arith.constant 0 : index
      %c8_98 = arith.constant 8 : index
      %110 = vector.load %arg8[%c0_96, %c0_97, %c8_98] : memref<12x16x12xf32, #tpu.memory_space<vmem>>, vector<2x16x4xf32>
      tpu.vector_store %arg8[%c0_96, %c0_97, %c8_98], %109 {strides = array<i32>} : memref<12x16x12xf32, #tpu.memory_space<vmem>>, vector<2x16x4xf32>,
    } else {
    }
    %c1_i32 = arith.constant 1 : i32
    %19 = arith.cmpi eq, %arg1, %c1_i32 : i32
    %20 = arith.extui %19 : i1 to i32
    %c0_i32_11 = arith.constant 0 : i32
    %21 = arith.cmpi ne, %20, %c0_i32_11 : i32
    scf.if %21 {
      %cst_86 = arith.constant 0.000000e+00 : f32
      %99 = vector.broadcast %cst_86 : f32 to vector<2x16x12xf32>
      %c10 = arith.constant 10 : index
      %c0_87 = arith.constant 0 : index
      %c0_88 = arith.constant 0 : index
      %100 = vector.load %arg8[%c10, %c0_87, %c0_88] : memref<12x16x12xf32, #tpu.memory_space<vmem>>, vector<2x16x12xf32>
      tpu.vector_store %arg8[%c10, %c0_87, %c0_88], %99 {strides = array<i32>} : memref<12x16x12xf32, #tpu.memory_space<vmem>>, vector<2x16x12xf32>,
    } else {
    }
    %c1_i32_12 = arith.constant 1 : i32
    %22 = arith.cmpi slt, %arg1, %c1_i32_12 : i32
    %23 = arith.extui %22 : i1 to i32
    %c0_i32_13 = arith.constant 0 : i32
    %24 = arith.cmpi ne, %23, %c0_i32_13 : i32
    scf.if %24 {
      %c8_i32_86 = arith.constant 8 : i32
      %99 = arith.addi %1, %c8_i32_86 : i32
      %c0_87 = arith.constant 0 : index
      %100 = arith.index_cast %99 : i32 to index
      %c0_88 = arith.constant 0 : index
      %c0_89 = arith.constant 0 : index
      %101 = vector.load %arg2[%c0_87, %100, %c0_88, %c0_89] : memref<1x16x16x4xf32, #tpu.memory_space<vmem>>, vector<1x2x16x4xf32>
      %102 = vector.shape_cast %101 : vector<1x2x16x4xf32> to vector<2x16x4xf32>
      %cst_90 = arith.constant 0.000000e+00 : f32
      %103 = vector.broadcast %cst_90 : f32 to vector<2x1x4xf32>
      %104 = tpu.concatenate %103, %102, %103 in 1 : vector<2x1x4xf32>, vector<2x16x4xf32>, vector<2x1x4xf32> -> vector<2x18x4xf32>
      %105 = vector.extract_strided_slice %104 {offsets = [0, 0, 0], sizes = [2, 16, 4], strides = [1, 1, 1]} : vector<2x18x4xf32> to vector<2x16x4xf32>
      %c10 = arith.constant 10 : index
      %c0_91 = arith.constant 0 : index
      %c0_92 = arith.constant 0 : index
      %106 = vector.load %arg8[%c10, %c0_91, %c0_92] : memref<12x16x12xf32, #tpu.memory_space<vmem>>, vector<2x16x4xf32>
      tpu.vector_store %arg8[%c10, %c0_91, %c0_92], %105 {strides = array<i32>} : memref<12x16x12xf32, #tpu.memory_space<vmem>>, vector<2x16x4xf32>,
      %107 = vector.extract_strided_slice %104 {offsets = [0, 1, 0], sizes = [2, 16, 4], strides = [1, 1, 1]} : vector<2x18x4xf32> to vector<2x16x4xf32>
      %c10_93 = arith.constant 10 : index
      %c0_94 = arith.constant 0 : index
      %c4_95 = arith.constant 4 : index
      %108 = vector.load %arg8[%c10_93, %c0_94, %c4_95] : memref<12x16x12xf32, #tpu.memory_space<vmem>>, vector<2x16x4xf32>
      tpu.vector_store %arg8[%c10_93, %c0_94, %c4_95], %107 {strides = array<i32>} : memref<12x16x12xf32, #tpu.memory_space<vmem>>, vector<2x16x4xf32>,
      %109 = vector.extract_strided_slice %104 {offsets = [0, 2, 0], sizes = [2, 16, 4], strides = [1, 1, 1]} : vector<2x18x4xf32> to vector<2x16x4xf32>
      %c10_96 = arith.constant 10 : index
      %c0_97 = arith.constant 0 : index
      %c8_98 = arith.constant 8 : index
      %110 = vector.load %arg8[%c10_96, %c0_97, %c8_98] : memref<12x16x12xf32, #tpu.memory_space<vmem>>, vector<2x16x4xf32>
      tpu.vector_store %arg8[%c10_96, %c0_97, %c8_98], %109 {strides = array<i32>} : memref<12x16x12xf32, #tpu.memory_space<vmem>>, vector<2x16x4xf32>,
    } else {
    }
    %c0_14 = arith.constant 0 : index
    %c0_15 = arith.constant 0 : index
    %25 = vector.load %arg5[%c0_14, %c0_15] : memref<2x4xf32, #tpu.memory_space<vmem>>, vector<1x4xf32>
    %c1 = arith.constant 1 : index
    %c0_16 = arith.constant 0 : index
    %26 = vector.load %arg5[%c1, %c0_16] : memref<2x4xf32, #tpu.memory_space<vmem>>, vector<1x4xf32>
    %c0_17 = arith.constant 0 : index
    %c0_18 = arith.constant 0 : index
    %c0_19 = arith.constant 0 : index
    %27 = vector.load %arg8[%c0_17, %c0_18, %c0_19] : memref<12x16x12xf32, #tpu.memory_space<vmem>>, vector<10x16x12xf32>
    %28 = vector.shape_cast %27 : vector<10x16x12xf32> to vector<160x12xf32>
    %c0_20 = arith.constant 0 : index
    %c0_21 = arith.constant 0 : index
    %c0_22 = arith.constant 0 : index
    %29 = vector.load %arg3[%c0_20, %c0_21, %c0_22] : memref<3x12x4xf32, #tpu.memory_space<vmem>>, vector<1x12x4xf32>
    %30 = vector.shape_cast %29 : vector<1x12x4xf32> to vector<12x4xf32>
    %cst_23 = arith.constant dense<0.000000e+00> : vector<160x4xf32>
    %31 = tpu.matmul %28, %30, %cst_23 {dimension_numbers = #tpu.dot_dimension_numbers<[1], [0], [0], [1], [0, 0, 1, 1], [], []>} : vector<160x12xf32>, vector<12x4xf32>, vector<160x4xf32> -> vector<160x4xf32>
    %c1_24 = arith.constant 1 : index
    %c0_25 = arith.constant 0 : index
    %c0_26 = arith.constant 0 : index
    %32 = vector.load %arg8[%c1_24, %c0_25, %c0_26] : memref<12x16x12xf32, #tpu.memory_space<vmem>>, vector<10x16x12xf32>
    %33 = vector.shape_cast %32 : vector<10x16x12xf32> to vector<160x12xf32>
    %c1_27 = arith.constant 1 : index
    %c0_28 = arith.constant 0 : index
    %c0_29 = arith.constant 0 : index
    %34 = vector.load %arg3[%c1_27, %c0_28, %c0_29] : memref<3x12x4xf32, #tpu.memory_space<vmem>>, vector<1x12x4xf32>
    %35 = vector.shape_cast %34 : vector<1x12x4xf32> to vector<12x4xf32>
    %cst_30 = arith.constant dense<0.000000e+00> : vector<160x4xf32>
    %36 = tpu.matmul %33, %35, %cst_30 {dimension_numbers = #tpu.dot_dimension_numbers<[1], [0], [0], [1], [0, 0, 1, 1], [], []>} : vector<160x12xf32>, vector<12x4xf32>, vector<160x4xf32> -> vector<160x4xf32>
    %37 = arith.addf %31, %36 : vector<160x4xf32>
    %c2_31 = arith.constant 2 : index
    %c0_32 = arith.constant 0 : index
    %c0_33 = arith.constant 0 : index
    %38 = vector.load %arg8[%c2_31, %c0_32, %c0_33] : memref<12x16x12xf32, #tpu.memory_space<vmem>>, vector<10x16x12xf32>
    %39 = vector.shape_cast %38 : vector<10x16x12xf32> to vector<160x12xf32>
    %c2_34 = arith.constant 2 : index
    %c0_35 = arith.constant 0 : index
    %c0_36 = arith.constant 0 : index
    %40 = vector.load %arg3[%c2_34, %c0_35, %c0_36] : memref<3x12x4xf32, #tpu.memory_space<vmem>>, vector<1x12x4xf32>
    %41 = vector.shape_cast %40 : vector<1x12x4xf32> to vector<12x4xf32>
    %cst_37 = arith.constant dense<0.000000e+00> : vector<160x4xf32>
    %42 = tpu.matmul %39, %41, %cst_37 {dimension_numbers = #tpu.dot_dimension_numbers<[1], [0], [0], [1], [0, 0, 1, 1], [], []>} : vector<160x12xf32>, vector<12x4xf32>, vector<160x4xf32> -> vector<160x4xf32>
    %43 = arith.addf %37, %42 : vector<160x4xf32>
    %44 = vector.broadcast %25 : vector<1x4xf32> to vector<160x4xf32>
    %45 = arith.mulf %43, %44 : vector<160x4xf32>
    %46 = vector.broadcast %26 : vector<1x4xf32> to vector<160x4xf32>
    %47 = arith.addf %45, %46 : vector<160x4xf32>
    %cst_38 = arith.constant 0.000000e+00 : f32
    %48 = vector.broadcast %cst_38 : f32 to vector<160x4xf32>
    %49 = arith.maximumf %47, %48 : vector<160x4xf32>
    %50 = vector.shape_cast %49 : vector<160x4xf32> to vector<10x16x4xf32>
    %cst_39 = arith.constant 0.000000e+00 : f32
    %51 = vector.broadcast %cst_39 : f32 to vector<10x1x4xf32>
    %52 = tpu.concatenate %51, %50, %51 in 1 : vector<10x1x4xf32>, vector<10x16x4xf32>, vector<10x1x4xf32> -> vector<10x18x4xf32>
    %53 = vector.extract_strided_slice %52 {offsets = [0, 0, 0], sizes = [10, 16, 4], strides = [1, 1, 1]} : vector<10x18x4xf32> to vector<10x16x4xf32>
    %c0_40 = arith.constant 0 : index
    %c0_41 = arith.constant 0 : index
    %c0_42 = arith.constant 0 : index
    %54 = vector.load %arg8[%c0_40, %c0_41, %c0_42] : memref<12x16x12xf32, #tpu.memory_space<vmem>>, vector<10x16x4xf32>
    tpu.vector_store %arg8[%c0_40, %c0_41, %c0_42], %53 {strides = array<i32>} : memref<12x16x12xf32, #tpu.memory_space<vmem>>, vector<10x16x4xf32>,
    %55 = vector.extract_strided_slice %52 {offsets = [0, 1, 0], sizes = [10, 16, 4], strides = [1, 1, 1]} : vector<10x18x4xf32> to vector<10x16x4xf32>
    %c0_43 = arith.constant 0 : index
    %c0_44 = arith.constant 0 : index
    %c4_45 = arith.constant 4 : index
    %56 = vector.load %arg8[%c0_43, %c0_44, %c4_45] : memref<12x16x12xf32, #tpu.memory_space<vmem>>, vector<10x16x4xf32>
    tpu.vector_store %arg8[%c0_43, %c0_44, %c4_45], %55 {strides = array<i32>} : memref<12x16x12xf32, #tpu.memory_space<vmem>>, vector<10x16x4xf32>,
    %57 = vector.extract_strided_slice %52 {offsets = [0, 2, 0], sizes = [10, 16, 4], strides = [1, 1, 1]} : vector<10x18x4xf32> to vector<10x16x4xf32>
    %c0_46 = arith.constant 0 : index
    %c0_47 = arith.constant 0 : index
    %c8_48 = arith.constant 8 : index
    %58 = vector.load %arg8[%c0_46, %c0_47, %c8_48] : memref<12x16x12xf32, #tpu.memory_space<vmem>>, vector<10x16x4xf32>
    tpu.vector_store %arg8[%c0_46, %c0_47, %c8_48], %57 {strides = array<i32>} : memref<12x16x12xf32, #tpu.memory_space<vmem>>, vector<10x16x4xf32>,
    %c0_i32_49 = arith.constant 0 : i32
    %59 = arith.cmpi eq, %arg1, %c0_i32_49 : i32
    %60 = arith.extui %59 : i1 to i32
    %c0_i32_50 = arith.constant 0 : i32
    %61 = arith.cmpi ne, %60, %c0_i32_50 : i32
    scf.if %61 {
      %cst_86 = arith.constant 0.000000e+00 : f32
      %99 = vector.broadcast %cst_86 : f32 to vector<1x16x12xf32>
      %c0_87 = arith.constant 0 : index
      %c0_88 = arith.constant 0 : index
      %c0_89 = arith.constant 0 : index
      %100 = vector.load %arg8[%c0_87, %c0_88, %c0_89] : memref<12x16x12xf32, #tpu.memory_space<vmem>>, vector<1x16x12xf32>
      tpu.vector_store %arg8[%c0_87, %c0_88, %c0_89], %99 {strides = array<i32>} : memref<12x16x12xf32, #tpu.memory_space<vmem>>, vector<1x16x12xf32>,
    } else {
    }
    %c1_i32_51 = arith.constant 1 : i32
    %62 = arith.cmpi eq, %arg1, %c1_i32_51 : i32
    %63 = arith.extui %62 : i1 to i32
    %c0_i32_52 = arith.constant 0 : i32
    %64 = arith.cmpi ne, %63, %c0_i32_52 : i32
    scf.if %64 {
      %cst_86 = arith.constant 0.000000e+00 : f32
      %99 = vector.broadcast %cst_86 : f32 to vector<1x16x12xf32>
      %c9 = arith.constant 9 : index
      %c0_87 = arith.constant 0 : index
      %c0_88 = arith.constant 0 : index
      %100 = vector.load %arg8[%c9, %c0_87, %c0_88] : memref<12x16x12xf32, #tpu.memory_space<vmem>>, vector<1x16x12xf32>
      tpu.vector_store %arg8[%c9, %c0_87, %c0_88], %99 {strides = array<i32>} : memref<12x16x12xf32, #tpu.memory_space<vmem>>, vector<1x16x12xf32>,
    } else {
    }
    %c0_53 = arith.constant 0 : index
    %c0_54 = arith.constant 0 : index
    %65 = vector.load %arg6[%c0_53, %c0_54] : memref<2x4xf32, #tpu.memory_space<vmem>>, vector<1x4xf32>
    %c1_55 = arith.constant 1 : index
    %c0_56 = arith.constant 0 : index
    %66 = vector.load %arg6[%c1_55, %c0_56] : memref<2x4xf32, #tpu.memory_space<vmem>>, vector<1x4xf32>
    %c0_57 = arith.constant 0 : index
    %c0_58 = arith.constant 0 : index
    %c0_59 = arith.constant 0 : index
    %67 = vector.load %arg8[%c0_57, %c0_58, %c0_59] : memref<12x16x12xf32, #tpu.memory_space<vmem>>, vector<8x16x12xf32>
    %68 = vector.shape_cast %67 : vector<8x16x12xf32> to vector<128x12xf32>
    %c0_60 = arith.constant 0 : index
    %c0_61 = arith.constant 0 : index
    %c0_62 = arith.constant 0 : index
    %69 = vector.load %arg4[%c0_60, %c0_61, %c0_62] : memref<3x12x4xf32, #tpu.memory_space<vmem>>, vector<1x12x4xf32>
    %70 = vector.shape_cast %69 : vector<1x12x4xf32> to vector<12x4xf32>
    %cst_63 = arith.constant dense<0.000000e+00> : vector<128x4xf32>
    %71 = tpu.matmul %68, %70, %cst_63 {dimension_numbers = #tpu.dot_dimension_numbers<[1], [0], [0], [1], [0, 0, 1, 1], [], []>} : vector<128x12xf32>, vector<12x4xf32>, vector<128x4xf32> -> vector<128x4xf32>
    %c1_64 = arith.constant 1 : index
    %c0_65 = arith.constant 0 : index
    %c0_66 = arith.constant 0 : index
    %72 = vector.load %arg8[%c1_64, %c0_65, %c0_66] : memref<12x16x12xf32, #tpu.memory_space<vmem>>, vector<8x16x12xf32>
    %73 = vector.shape_cast %72 : vector<8x16x12xf32> to vector<128x12xf32>
    %c1_67 = arith.constant 1 : index
    %c0_68 = arith.constant 0 : index
    %c0_69 = arith.constant 0 : index
    %74 = vector.load %arg4[%c1_67, %c0_68, %c0_69] : memref<3x12x4xf32, #tpu.memory_space<vmem>>, vector<1x12x4xf32>
    %75 = vector.shape_cast %74 : vector<1x12x4xf32> to vector<12x4xf32>
    %cst_70 = arith.constant dense<0.000000e+00> : vector<128x4xf32>
    %76 = tpu.matmul %73, %75, %cst_70 {dimension_numbers = #tpu.dot_dimension_numbers<[1], [0], [0], [1], [0, 0, 1, 1], [], []>} : vector<128x12xf32>, vector<12x4xf32>, vector<128x4xf32> -> vector<128x4xf32>
    %77 = arith.addf %71, %76 : vector<128x4xf32>
    %c2_71 = arith.constant 2 : index
    %c0_72 = arith.constant 0 : index
    %c0_73 = arith.constant 0 : index
    %78 = vector.load %arg8[%c2_71, %c0_72, %c0_73] : memref<12x16x12xf32, #tpu.memory_space<vmem>>, vector<8x16x12xf32>
    %79 = vector.shape_cast %78 : vector<8x16x12xf32> to vector<128x12xf32>
    %c2_74 = arith.constant 2 : index
    %c0_75 = arith.constant 0 : index
    %c0_76 = arith.constant 0 : index
    %80 = vector.load %arg4[%c2_74, %c0_75, %c0_76] : memref<3x12x4xf32, #tpu.memory_space<vmem>>, vector<1x12x4xf32>
    %81 = vector.shape_cast %80 : vector<1x12x4xf32> to vector<12x4xf32>
    %cst_77 = arith.constant dense<0.000000e+00> : vector<128x4xf32>
    %82 = tpu.matmul %79, %81, %cst_77 {dimension_numbers = #tpu.dot_dimension_numbers<[1], [0], [0], [1], [0, 0, 1, 1], [], []>} : vector<128x12xf32>, vector<12x4xf32>, vector<128x4xf32> -> vector<128x4xf32>
    %83 = arith.addf %77, %82 : vector<128x4xf32>
    %84 = vector.broadcast %65 : vector<1x4xf32> to vector<128x4xf32>
    %85 = arith.mulf %83, %84 : vector<128x4xf32>
    %86 = vector.broadcast %66 : vector<1x4xf32> to vector<128x4xf32>
    %87 = arith.addf %85, %86 : vector<128x4xf32>
    %c0_78 = arith.constant 0 : index
    %88 = arith.index_cast %1 : i32 to index
    %c0_79 = arith.constant 0 : index
    %c0_80 = arith.constant 0 : index
    %89 = vector.load %arg2[%c0_78, %88, %c0_79, %c0_80] : memref<1x16x16x4xf32, #tpu.memory_space<vmem>>, vector<1x8x16x4xf32>
    %90 = vector.shape_cast %89 : vector<1x8x16x4xf32> to vector<8x16x4xf32>
    %91 = vector.shape_cast %90 : vector<8x16x4xf32> to vector<128x4xf32>
    %92 = arith.addf %87, %91 : vector<128x4xf32>
    %cst_81 = arith.constant 0.000000e+00 : f32
    %93 = vector.broadcast %cst_81 : f32 to vector<128x4xf32>
    %94 = arith.maximumf %92, %93 : vector<128x4xf32>
    %95 = vector.shape_cast %94 : vector<128x4xf32> to vector<8x16x4xf32>
    %c0_82 = arith.constant 0 : index
    %c0_83 = arith.constant 0 : index
    %c0_84 = arith.constant 0 : index
    %c0_85 = arith.constant 0 : index
    %96 = vector.load %arg7[%c0_82, %c0_83, %c0_84, %c0_85] : memref<1x8x16x4xf32, #tpu.memory_space<vmem>>, vector<1x8x16x4xf32>
    %97 = vector.shape_cast %96 : vector<1x8x16x4xf32> to vector<8x16x4xf32>
    %98 = vector.shape_cast %95 : vector<8x16x4xf32> to vector<1x8x16x4xf32>
    tpu.vector_store %arg7[%c0_82, %c0_83, %c0_84, %c0_85], %98 {strides = array<i32>} : memref<1x8x16x4xf32, #tpu.memory_space<vmem>>, vector<1x8x16x4xf32>,
    return
  }
  func.func @transform_0(%arg0: i32, %arg1: i32) -> (i32, i32, i32, i32) {
    %c0_i32 = arith.constant 0 : i32
    %c0_i32_0 = arith.constant 0 : i32
    %c0_i32_1 = arith.constant 0 : i32
    %c0_i32_2 = arith.constant 0 : i32
    return %arg0, %c0_i32, %c0_i32_0, %c0_i32_1 : i32, i32, i32, i32
  }
  func.func @transform_1(%arg0: i32, %arg1: i32) -> (i32, i32, i32) {
    %c0_i32 = arith.constant 0 : i32
    %c0_i32_0 = arith.constant 0 : i32
    %c0_i32_1 = arith.constant 0 : i32
    %c0_i32_2 = arith.constant 0 : i32
    return %c0_i32, %c0_i32_0, %c0_i32_1 : i32, i32, i32
  }
  func.func @transform_2(%arg0: i32, %arg1: i32) -> (i32, i32, i32) {
    %c0_i32 = arith.constant 0 : i32
    %c0_i32_0 = arith.constant 0 : i32
    %c0_i32_1 = arith.constant 0 : i32
    %c0_i32_2 = arith.constant 0 : i32
    return %c0_i32, %c0_i32_0, %c0_i32_1 : i32, i32, i32
  }
  func.func @transform_3(%arg0: i32, %arg1: i32) -> (i32, i32) {
    %c0_i32 = arith.constant 0 : i32
    %c0_i32_0 = arith.constant 0 : i32
    %c0_i32_1 = arith.constant 0 : i32
    return %c0_i32, %c0_i32_0 : i32, i32
  }
  func.func @transform_4(%arg0: i32, %arg1: i32) -> (i32, i32) {
    %c0_i32 = arith.constant 0 : i32
    %c0_i32_0 = arith.constant 0 : i32
    %c0_i32_1 = arith.constant 0 : i32
    return %c0_i32, %c0_i32_0 : i32, i32
  }
  func.func @transform_5(%arg0: i32, %arg1: i32) -> (i32, i32, i32, i32) {
    %c0_i32 = arith.constant 0 : i32
    %c0_i32_0 = arith.constant 0 : i32
    %c0_i32_1 = arith.constant 0 : i32
    return %arg0, %arg1, %c0_i32, %c0_i32_0 : i32, i32, i32, i32
  }
}

</mosaic_0001>

<bundles_post_ra>
// kernel: tpu_custom_call.1
= control target key start
LH: loop header
LB: loop body
LE: loop exit
PB: predicated region body
PF: predicated region fallthrough
CT: control target
= control target key end

     0   :  { %s3582_s18 = smov 0   ;;  %s3584_s19 = smov 0   ;;  %s4525_s0 = inlined_call_operand.vmem [shape: f32[2,16,16,4], index: 0, kind: input, shape index: {}]   ;;  %s4526_s1 = inlined_call_operand.vmem [shape: f32[3,12,4], index: 1, kind: input, shape index: {}]   ;;  %s4527_s2 = inlined_call_operand.vmem [shape: f32[3,12,4], index: 2, kind: input, shape index: {}]   ;;  %s4528_s3 = inlined_call_operand.vmem [shape: f32[2,4], index: 3, kind: input, shape index: {}]   ;;  %s4529_s4 = inlined_call_operand.vmem [shape: f32[2,4], index: 4, kind: input, shape index: {}]   ;;  %s4530_s5 = inlined_call_operand.vmem [shape: f32[2,16,16,4], index: 5, kind: output, shape index: {}]  }
   0x1   :  { %s3586_s20 = smov 0   ;;  %s3588_s21 = smov 0  }
   0x2   :  { %s3590_s22 = smov 0  }
   0x3 LB: > { %s24_s23 = sadd.s32 1, %s3531_s20  ;;  %s27_s24 = sadd.s32 1, %s3535_s21  ;;  %s3539_s22 = sphi %s3590_s22, %s15_s22   ;;  %s3535_s21 = sphi %s3588_s21, %s4536_s21   ;;  %s3531_s20 = sphi %s3586_s20, %s4535_s20   ;;  %s3527_s19 = sphi %s3584_s19, %s4534_s19   ;;  %s3523_s18 = sphi %s3582_s18, %s4533_s18  }
   0x4   : > { %p25_p0 = scmp.ge.s32.totalorder %s24_s23, 2  ;;  %p2880_p1 = scmp.ge.s32.totalorder %s3539_s22, 1 }
   0x5   : > { %p201_p2 = scmp.lt.s32.totalorder %s3539_s22, 5 }
   0x6   : > { %s4538_s23 = smov (%p25_p0, %s24_s23), 0  ;;  %s4540_s24 = smov (!%p25_p0, %s27_s24), %s3535_s21 }
   0x7   : > { %p202_p3 = pnand %p2880_p1, %p201_p2  ;;  %p29_p4 = scmp.ge.s32.totalorder %s4540_s24, 2 }
   0x8   : > { %p234_p5 = scmp.lt.s32.totalorder (!%p202_p3), %s3527_s19, 1  ;;  %s3615_s25 = sshll.u32 (!%p202_p3), %s3523_s18, 3  ;;  %vm285_vm0 = vcmask (!%p202_p3), 1040384   ;;  %vm351_vm1 = vcmask (!%p202_p3), 31744   ;;  %vm460_vm2 = vcmask (!%p202_p3), 57376   ;;  %vm456_vm3 = vcmask (!%p202_p3), 64545  }
   0x9   : > { %s4542_s24 = smov (%p29_p4, %s4540_s24), 0  ;;  %205 = sbr.rel (%p202_p3) target bundleno = 1387 (0x56b), region = 40 }
   0xa   : > { %p242_p6 = scmp.lt.s32.totalorder (!%p202_p3), %s3615_s25, 15  ;;  %s3032_s26 = sshll.u32 (!%p202_p3), %s3523_s18, 7  ;;  %vm458_vm4 = vcmask (!%p202_p3), 64544   ;;  %vm557_vm5 = vcmask (!%p202_p3), 97344   ;;  %vm555_vm6 = vcmask (!%p202_p3), 97346   ;;  %vm559_vm7 = vcmask (!%p202_p3), 91200  }
   0xb   : > { %s3541_s15 = smov (!%p202_p3), 4   ;;  %s3542_s16 = smov (!%p202_p3), 8  }
   0xc   : > { %p2889_p7 = scmp.ne.s32.totalorder (!%p202_p3), %s3523_s18, 0 }
  0x10   : > { %s4544_s19 = smov (!%p234_p5, %s3527_s19), 1  ;;  %vm586_vm8 = vcmask (!%p2889_p7), 97280  }
  0x11   : > { %s243_s27 = scalar_select %p242_p6, %s3615_s25, 15 }
  0x12   : > { %s3031_s28 = sshll.u32 %s4544_s19, 8  ;;  %s2885_s29 = sshll.u32 %s4544_s19, 5 }
  0x13   : > { %s3623_s7 = scalar_lea.vmem %s4525_s0, %s3031_s28  ;;  %s2884_s8 = sshll.u32 %s243_s27, 1 }
  0x14   : > { %s246_s9 = sadd.s32 %s2885_s29, %s2884_s8  ;;  %s3626_s10 = scalar_lea.vmem %s3623_s7, %s3032_s26 }
  0x15   : > { %s2886_s11 = sshll.u32 %s246_s9, 3  ;;  %v254_v0 = vld [vmem:[%s3626_s10 + $0x8] sm:$0xff]  ;;  %v253_v1 = vld [vmem:[%s3626_s10] sm:$0xff]  ;;  %v255_v2 = vld [vmem:[%s3626_s10 + $0x10] sm:$0xff] }
  0x16   : > { %s3634_s14 = scalar_lea.vmem %s4530_s5, %s2886_s11  ;;  %v287_v3 = vrot.slane %v254_v0, 7  ;;  %v286_v4 = vrot.slane %v253_v1, 7  ;;  %v289_v5 = vrot.slane %v255_v2, 7  ;;  %v256_v6 = vld [vmem:[%s3626_s10 + $0x18] sm:$0xff]  ;;  %v257_v7 = vld [vmem:[%s3626_s10 + $0x20] sm:$0xff]  ;;  %v3639_v8 = vld [vmem:[%s3626_s10 + $0x28] sm:$0xff] }
  0x17   : > { %v290_v9 = vrot.slane %v256_v6, 7  ;;  %v292_v10 = vrot.slane %v257_v7, 7  ;;  %v293_v11 = vrot.slane %v3639_v8, 7  ;;  %v259_v12 = vld [vmem:[%s3626_s10 + $0x30] sm:$0xff]  ;;  %v3644_v13 = vld [vmem:[%s3626_s10 + $0x38] sm:$0xff]  ;;  %v261_v14 = vld [vmem:[%s3626_s10 + $0x40] sm:$0xff] }
  0x18   : > { %v3648_v15 = vsel %vm285_vm0, %v287_v3, 0.0  ;;  %v3651_v16 = vsel %vm285_vm0, 0.0, %v286_v4  ;;  %v3654_v17 = vsel %vm285_vm0, 0.0, %v289_v5  ;;  %v3657_v18 = vsel %vm285_vm0, %v286_v4, %v287_v3  ;;  %v3660_v19 = vld [vmem:[%s3626_s10 + $0x48] sm:$0xff]  ;;  %v263_v20 = vld [vmem:[%s3626_s10 + $0x50] sm:$0xff]  ;;  %v3664_v21 = vld [vmem:[%s3626_s10 + $0x58] sm:$0xff] }
  0x19   : > { %388 = vrot.lane.b32.xlu1 %v3648_v15, %s3541_s15  ;;  %384 = vrot.lane.b32.xlu0 %v3651_v16, %s3541_s15  ;;  %v3671_v22 = vsel %vm285_vm0, %v289_v5, %v290_v9  ;;  %v3676_v23 = vsel %vm285_vm0, %v292_v10, %v293_v11  ;;  %352 = vst.msk [vmem:[#allocation2 + $0x20] sm:$0xff] %vm351_vm1, %v3651_v16  ;;  %353 = vst.msk [vmem:[#allocation2 + $0x28] sm:$0xff] %vm351_vm1, %v3657_v18  ;;  %v3685_v24 = vsel %vm285_vm0, 0.0, %v292_v10  ;;  %v265_v25 = vld [vmem:[%s3626_s10 + $0x60] sm:$0xff]  ;;  %v266_v32 = vld [vmem:[%s3626_s10 + $0x68] sm:$0xff] }
  0x1a   : > { %354 = vst.msk [vmem:[#allocation2 + $0x30] sm:$0xff] %vm351_vm1, %v3654_v17  ;;  %357 = vst.msk [vmem:[#allocation2 + $0x48] sm:$0xff] %vm351_vm1, %v3676_v23  ;;  %v295_v26 = vrot.slane %v259_v12, 7  ;;  %v296_v27 = vrot.slane %v3644_v13, 7  ;;  %v298_v28 = vrot.slane %v261_v14, 7  ;;  %v299_v29 = vrot.slane %v3660_v19, 7 }
  0x1b   : > { %355 = vst.msk [vmem:[#allocation2 + $0x38] sm:$0xff] %vm351_vm1, %v3671_v22  ;;  %356 = vst.msk [vmem:[#allocation2 + $0x40] sm:$0xff] %vm351_vm1, %v3685_v24  ;;  %v301_v30 = vrot.slane %v263_v20, 7  ;;  %v302_v31 = vrot.slane %v3664_v21, 7  ;;  %v304_v33 = vrot.slane %v265_v25, 7  ;;  %v267_v34 = vld [vmem:[%s3626_s10 + $0x70] sm:$0xff] }
  0x1c   : > { %v337_v35 = vsel %vm285_vm0, 0.0, %v295_v26  ;;  %v3701_v36 = vsel %vm285_vm0, %v295_v26, %v296_v27  ;;  %v3704_v37 = vsel %vm285_vm0, 0.0, %v298_v28  ;;  %v268_v38 = vld [vmem:[%s3626_s10 + $0x78] sm:$0xff]  ;;  %v343_v39 = vsel %vm285_vm0, %v290_v9, 0.0 }
  0x1d   : > { %390 = vrot.lane.b32.xlu1 %v3654_v17, %s3541_s15  ;;  %386 = vrot.lane.b32.xlu0 %v3657_v18, %s3541_s15  ;;  %358 = vst.msk [vmem:[#allocation2 + $0x50] sm:$0xff] %vm351_vm1, %v337_v35  ;;  %359 = vst.msk [vmem:[#allocation2 + $0x58] sm:$0xff] %vm351_vm1, %v3701_v36  ;;  %v300_v40 = vsel %vm285_vm0, %v298_v28, %v299_v29  ;;  %v339_v41 = vsel %vm285_vm0, 0.0, %v301_v30  ;;  %v303_v42 = vsel %vm285_vm0, %v301_v30, %v302_v31 }
  0x1e   : > { %360 = vst.msk [vmem:[#allocation2 + $0x60] sm:$0xff] %vm351_vm1, %v3704_v37  ;;  %361 = vst.msk [vmem:[#allocation2 + $0x68] sm:$0xff] %vm351_vm1, %v300_v40  ;;  %v305_v43 = vrot.slane %v266_v32, 7  ;;  %v340_v44 = vsel %vm285_vm0, 0.0, %v304_v33  ;;  %v307_v45 = vrot.slane %v267_v34, 7  ;;  %v308_v46 = vrot.slane %v268_v38, 7 }
  0x1f   : > { %362 = vst.msk [vmem:[#allocation2 + $0x70] sm:$0xff] %vm351_vm1, %v339_v41  ;;  %363 = vst.msk [vmem:[#allocation2 + $0x78] sm:$0xff] %vm351_vm1, %v303_v42  ;;  %v344_v50 = vsel %vm285_vm0, %v293_v11, 0.0  ;;  %v345_v51 = vsel %vm285_vm0, %v296_v27, 0.0  ;;  %v346_v52 = vsel %vm285_vm0, %v299_v29, 0.0  ;;  %v347_v53 = vsel %vm285_vm0, %v302_v31, 0.0 }
  0x20   : > { %364 = vst.msk [vmem:[#allocation2 + $0x80] sm:$0xff] %vm351_vm1, %v340_v44  ;;  %v306_v47 = vsel %vm285_vm0, %v304_v33, %v305_v43  ;;  %v341_v48 = vsel %vm285_vm0, 0.0, %v307_v45  ;;  %v309_v49 = vsel %vm285_vm0, %v307_v45, %v308_v46  ;;  %v348_v54 = vsel %vm285_vm0, %v305_v43, 0.0 }
  0x21   : > { %394 = vrot.lane.b32.xlu1 %v343_v39, %s3541_s15  ;;  %392 = vrot.lane.b32.xlu0 %v3671_v22, %s3541_s15  ;;  %365 = vst.msk [vmem:[#allocation2 + $0x88] sm:$0xff] %vm351_vm1, %v306_v47  ;;  %366 = vst.msk [vmem:[#allocation2 + $0x90] sm:$0xff] %vm351_vm1, %v341_v48  ;;  %v349_v55 = vsel %vm285_vm0, %v308_v46, 0.0 }
  0x22   : > { %367 = vst.msk [vmem:[#allocation2 + $0x98] sm:$0xff] %vm351_vm1, %v309_v49 }
  0x25   : > { %398 = vrot.lane.b32.xlu1 %v3676_v23, %s3541_s15  ;;  %396 = vrot.lane.b32.xlu0 %v3685_v24, %s3541_s15 }
  0x29   : > { %402 = vrot.lane.b32.xlu1 %v337_v35, %s3541_s15  ;;  %400 = vrot.lane.b32.xlu0 %v344_v50, %s3541_s15 }
  0x2d   : > { %406 = vrot.lane.b32.xlu1 %v345_v51, %s3541_s15  ;;  %404 = vrot.lane.b32.xlu0 %v3701_v36, %s3541_s15 }
  0x31   : > { %410 = vrot.lane.b32.xlu1 %v300_v40, %s3541_s15  ;;  %408 = vrot.lane.b32.xlu0 %v3704_v37, %s3541_s15 }
  0x35   : > { %414 = vrot.lane.b32.xlu1 %v339_v41, %s3541_s15  ;;  %412 = vrot.lane.b32.xlu0 %v346_v52, %s3541_s15 }
  0x39   : > { %418 = vrot.lane.b32.xlu1 %v347_v53, %s3541_s15  ;;  %416 = vrot.lane.b32.xlu0 %v303_v42, %s3541_s15 }
  0x3d   : > { %422 = vrot.lane.b32.xlu1 %v306_v47, %s3541_s15  ;;  %420 = vrot.lane.b32.xlu0 %v340_v44, %s3541_s15 }
  0x41   : > { %426 = vrot.lane.b32.xlu1 %v341_v48, %s3541_s15  ;;  %424 = vrot.lane.b32.xlu0 %v348_v54, %s3541_s15 }
  0x45   : > { %430 = vrot.lane.b32.xlu1 %v349_v55, %s3541_s15  ;;  %428 = vrot.lane.b32.xlu0 %v309_v49, %s3541_s15 }
  0x49   : > { %485 = vrot.lane.b32.xlu1 %v3657_v18, %s3542_s16  ;;  %483 = vrot.lane.b32.xlu0 %v3651_v16, %s3542_s16 }
  0x4d   : > { %489 = vrot.lane.b32.xlu1 %v3654_v17, %s3542_s16  ;;  %487 = vrot.lane.b32.xlu0 %v3648_v15, %s3542_s16 }
  0x51   : > { %493 = vrot.lane.b32.xlu1 %v343_v39, %s3542_s16  ;;  %491 = vrot.lane.b32.xlu0 %v3671_v22, %s3542_s16 }
  0x55   : > { %497 = vrot.lane.b32.xlu1 %v3676_v23, %s3542_s16  ;;  %495 = vrot.lane.b32.xlu0 %v3685_v24, %s3542_s16 }
  0x59   : > { %501 = vrot.lane.b32.xlu1 %v337_v35, %s3542_s16  ;;  %499 = vrot.lane.b32.xlu0 %v344_v50, %s3542_s16 }
  0x5d   : > { %505 = vrot.lane.b32.xlu1 %v345_v51, %s3542_s16  ;;  %503 = vrot.lane.b32.xlu0 %v3701_v36, %s3542_s16 }
  0x61   : > { %509 = vrot.lane.b32.xlu1 %v300_v40, %s3542_s16  ;;  %507 = vrot.lane.b32.xlu0 %v3704_v37, %s3542_s16  ;;  %v3543_v40 = vmov (!%p2889_p7), 0.0  }
  0x62   : > { %587 = vst.msk [vmem:[#allocation2] sm:$0xff] (!%p2889_p7), %vm586_vm8, %v3543_v40  ;;  %588 = vst.msk [vmem:[#allocation2 + $0x8] sm:$0xff] (!%p2889_p7), %vm586_vm8, %v3543_v40 }
  0x63   : > { %589 = vst.msk [vmem:[#allocation2 + $0x10] sm:$0xff] (!%p2889_p7), %vm586_vm8, %v3543_v40  ;;  %590 = vst.msk [vmem:[#allocation2 + $0x18] sm:$0xff] (!%p2889_p7), %vm586_vm8, %v3543_v40 }
  0x65   : > { %513 = vrot.lane.b32.xlu1 %v339_v41, %s3542_s16  ;;  %511 = vrot.lane.b32.xlu0 %v346_v52, %s3542_s16 }
  0x69   : > { %517 = vrot.lane.b32.xlu1 %v347_v53, %s3542_s16  ;;  %515 = vrot.lane.b32.xlu0 %v303_v42, %s3542_s16 }
  0x6d   : > { %521 = vrot.lane.b32.xlu1 %v306_v47, %s3542_s16  ;;  %519 = vrot.lane.b32.xlu0 %v340_v44, %s3542_s16 }
  0x71   : > { %525 = vrot.lane.b32.xlu1 %v341_v48, %s3542_s16  ;;  %523 = vrot.lane.b32.xlu0 %v348_v54, %s3542_s16 }
  0x75   : > { %529 = vrot.lane.b32.xlu1 %v349_v55, %s3542_s16  ;;  %527 = vrot.lane.b32.xlu0 %v309_v49, %s3542_s16 }
  0x8b   : > { %v389_v56 = vpop.permute.xlu1 %388  ;;  %v385_v57 = vpop.permute.xlu0 %384 }
  0x8c   : > { %461 = vst.msk [vmem:[#allocation2 + $0x2f] sm:$0x1] %vm460_vm2, %v389_v56 }
  0x8d   : > { %457 = vst.msk [vmem:[#allocation2 + $0x1f] sm:$0xfe] %vm456_vm3, %v385_v57 }
  0x8f   : > { %v391_v58 = vpop.permute.xlu1 %390  ;;  %v387_v59 = vpop.permute.xlu0 %386 }
  0x90   : > { %462 = vst.msk [vmem:[#allocation2 + $0x2f] sm:$0xfe] %vm456_vm3, %v391_v58 }
  0x91   : > { %459 = vst.msk [vmem:[#allocation2 + $0x27] sm:$0xff] %vm458_vm4, %v387_v59 }
  0x93   : > { %v395_v60 = vpop.permute.xlu1 %394  ;;  %v393_v61 = vpop.permute.xlu0 %392 }
  0x94   : > { %464 = vst.msk [vmem:[#allocation2 + $0x3f] sm:$0x1] %vm460_vm2, %v395_v60 }
  0x95   : > { %463 = vst.msk [vmem:[#allocation2 + $0x37] sm:$0xff] %vm458_vm4, %v393_v61 }
  0x97   : > { %v399_v62 = vpop.permute.xlu1 %398  ;;  %v397_v63 = vpop.permute.xlu0 %396 }
  0x98   : > { %466 = vst.msk [vmem:[#allocation2 + $0x47] sm:$0xff] %vm458_vm4, %v399_v62 }
  0x99   : > { %465 = vst.msk [vmem:[#allocation2 + $0x3f] sm:$0xfe] %vm456_vm3, %v397_v63 }
  0x9b   : > { %v403_v0 = vpop.permute.xlu1 %402  ;;  %v401_v1 = vpop.permute.xlu0 %400 }
  0x9c   : > { %468 = vst.msk [vmem:[#allocation2 + $0x4f] sm:$0xfe] %vm456_vm3, %v403_v0 }
  0x9d   : > { %467 = vst.msk [vmem:[#allocation2 + $0x4f] sm:$0x1] %vm460_vm2, %v401_v1 }
  0x9f   : > { %v407_v2 = vpop.permute.xlu1 %406  ;;  %v405_v3 = vpop.permute.xlu0 %404 }
  0xa0   : > { %470 = vst.msk [vmem:[#allocation2 + $0x5f] sm:$0x1] %vm460_vm2, %v407_v2 }
  0xa1   : > { %469 = vst.msk [vmem:[#allocation2 + $0x57] sm:$0xff] %vm458_vm4, %v405_v3 }
  0xa3   : > { %v411_v4 = vpop.permute.xlu1 %410  ;;  %v409_v5 = vpop.permute.xlu0 %408 }
  0xa4   : > { %472 = vst.msk [vmem:[#allocation2 + $0x67] sm:$0xff] %vm458_vm4, %v411_v4 }
  0xa5   : > { %471 = vst.msk [vmem:[#allocation2 + $0x5f] sm:$0xfe] %vm456_vm3, %v409_v5 }
  0xa7   : > { %v415_v6 = vpop.permute.xlu1 %414  ;;  %v413_v7 = vpop.permute.xlu0 %412 }
  0xa8   : > { %474 = vst.msk [vmem:[#allocation2 + $0x6f] sm:$0xfe] %vm456_vm3, %v415_v6 }
  0xa9   : > { %473 = vst.msk [vmem:[#allocation2 + $0x6f] sm:$0x1] %vm460_vm2, %v413_v7 }
  0xab   : > { %v419_v8 = vpop.permute.xlu1 %418  ;;  %v417_v9 = vpop.permute.xlu0 %416 }
  0xac   : > { %476 = vst.msk [vmem:[#allocation2 + $0x7f] sm:$0x1] %vm460_vm2, %v419_v8 }
  0xad   : > { %475 = vst.msk [vmem:[#allocation2 + $0x77] sm:$0xff] %vm458_vm4, %v417_v9 }
  0xaf   : > { %v423_v10 = vpop.permute.xlu1 %422  ;;  %v421_v11 = vpop.permute.xlu0 %420 }
  0xb0   : > { %478 = vst.msk [vmem:[#allocation2 + $0x87] sm:$0xff] %vm458_vm4, %v423_v10 }
  0xb1   : > { %477 = vst.msk [vmem:[#allocation2 + $0x7f] sm:$0xfe] %vm456_vm3, %v421_v11 }
  0xb3   : > { %v427_v12 = vpop.permute.xlu1 %426  ;;  %v425_v13 = vpop.permute.xlu0 %424 }
  0xb4   : > { %480 = vst.msk [vmem:[#allocation2 + $0x8f] sm:$0xfe] %vm456_vm3, %v427_v12 }
  0xb5   : > { %479 = vst.msk [vmem:[#allocation2 + $0x8f] sm:$0x1] %vm460_vm2, %v425_v13 }
  0xb7   : > { %v431_v14 = vpop.permute.xlu1 %430  ;;  %v429_v15 = vpop.permute.xlu0 %428 }
  0xb8   : > { %482 = vst.msk [vmem:[#allocation2 + $0x9f] sm:$0x1] %vm460_vm2, %v431_v14 }
  0xb9   : > { %481 = vst.msk [vmem:[#allocation2 + $0x97] sm:$0xff] %vm458_vm4, %v429_v15 }
  0xbb   : > { %v486_v16 = vpop.permute.xlu1 %485  ;;  %v484_v17 = vpop.permute.xlu0 %483 }
  0xbc   : > { %558 = vst.msk [vmem:[#allocation2 + $0x26] sm:$0xff] %vm557_vm5, %v486_v16 }
  0xbd   : > { %556 = vst.msk [vmem:[#allocation2 + $0x1e] sm:$0xfc] %vm555_vm6, %v484_v17 }
  0xbf   : > { %v490_v18 = vpop.permute.xlu1 %489  ;;  %v488_v19 = vpop.permute.xlu0 %487 }
  0xc0   : > { %561 = vst.msk [vmem:[#allocation2 + $0x2e] sm:$0xfc] %vm555_vm6, %v490_v18 }
  0xc1   : > { %560 = vst.msk [vmem:[#allocation2 + $0x2e] sm:$0x3] %vm559_vm7, %v488_v19 }
  0xc3   : > { %v494_v20 = vpop.permute.xlu1 %493  ;;  %v492_v21 = vpop.permute.xlu0 %491 }
  0xc4   : > { %563 = vst.msk [vmem:[#allocation2 + $0x3e] sm:$0x3] %vm559_vm7, %v494_v20 }
  0xc5   : > { %562 = vst.msk [vmem:[#allocation2 + $0x36] sm:$0xff] %vm557_vm5, %v492_v21 }
  0xc7   : > { %v498_v22 = vpop.permute.xlu1 %497  ;;  %v496_v23 = vpop.permute.xlu0 %495 }
  0xc8   : > { %565 = vst.msk [vmem:[#allocation2 + $0x46] sm:$0xff] %vm557_vm5, %v498_v22 }
  0xc9   : > { %564 = vst.msk [vmem:[#allocation2 + $0x3e] sm:$0xfc] %vm555_vm6, %v496_v23 }
  0xcb   : > { %v502_v24 = vpop.permute.xlu1 %501  ;;  %v500_v25 = vpop.permute.xlu0 %499 }
  0xcc   : > { %567 = vst.msk [vmem:[#allocation2 + $0x4e] sm:$0xfc] %vm555_vm6, %v502_v24 }
  0xcd   : > { %566 = vst.msk [vmem:[#allocation2 + $0x4e] sm:$0x3] %vm559_vm7, %v500_v25 }
  0xcf   : > { %v506_v26 = vpop.permute.xlu1 %505  ;;  %v504_v27 = vpop.permute.xlu0 %503 }
  0xd0   : > { %569 = vst.msk [vmem:[#allocation2 + $0x5e] sm:$0x3] %vm559_vm7, %v506_v26 }
  0xd1   : > { %568 = vst.msk [vmem:[#allocation2 + $0x56] sm:$0xff] %vm557_vm5, %v504_v27 }
  0xd3   : > { %v510_v28 = vpop.permute.xlu1 %509  ;;  %v508_v29 = vpop.permute.xlu0 %507 }
  0xd4   : > { %571 = vst.msk [vmem:[#allocation2 + $0x66] sm:$0xff] %vm557_vm5, %v510_v28 }
  0xd5   : > { %570 = vst.msk [vmem:[#allocation2 + $0x5e] sm:$0xfc] %vm555_vm6, %v508_v29 }
  0xd7   : > { %v514_v30 = vpop.permute.xlu1 %513  ;;  %v512_v31 = vpop.permute.xlu0 %511 }
  0xd8   : > { %573 = vst.msk [vmem:[#allocation2 + $0x6e] sm:$0xfc] %vm555_vm6, %v514_v30 }
  0xd9   : > { %572 = vst.msk [vmem:[#allocation2 + $0x6e] sm:$0x3] %vm559_vm7, %v512_v31 }
  0xdb   : > { %v518_v32 = vpop.permute.xlu1 %517  ;;  %v516_v33 = vpop.permute.xlu0 %515 }
  0xdc   : > { %575 = vst.msk [vmem:[#allocation2 + $0x7e] sm:$0x3] %vm559_vm7, %v518_v32 }
  0xdd   : > { %574 = vst.msk [vmem:[#allocation2 + $0x76] sm:$0xff] %vm557_vm5, %v516_v33 }
  0xdf   : > { %v522_v34 = vpop.permute.xlu1 %521  ;;  %v520_v35 = vpop.permute.xlu0 %519 }
  0xe0   : > { %577 = vst.msk [vmem:[#allocation2 + $0x86] sm:$0xff] %vm557_vm5, %v522_v34 }
  0xe1   : > { %576 = vst.msk [vmem:[#allocation2 + $0x7e] sm:$0xfc] %vm555_vm6, %v520_v35 }
  0xe3   : > { %v526_v36 = vpop.permute.xlu1 %525  ;;  %v524_v37 = vpop.permute.xlu0 %523  ;;  %585 = sbr.rel (%p2889_p7) target bundleno = 234 (0xea), region = 44 }
  0xe4   : > { %579 = vst.msk [vmem:[#allocation2 + $0x8e] sm:$0xfc] %vm555_vm6, %v526_v36 }
  0xe5   : > { %578 = vst.msk [vmem:[#allocation2 + $0x8e] sm:$0x3] %vm559_vm7, %v524_v37 }
  0xe7   : > { %v530_v38 = vpop.permute.xlu1 %529  ;;  %v528_v39 = vpop.permute.xlu0 %527 }
  0xe8   : > { %581 = vst.msk [vmem:[#allocation2 + $0x9e] sm:$0x3] %vm559_vm7, %v530_v38 }
  0xe9   : > { %580 = vst.msk [vmem:[#allocation2 + $0x96] sm:$0xff] %vm557_vm5, %v528_v39 }
  0xea PF: > { %p2890_p8 = scmp.le.s32.totalorder %s3523_s18, 0 }
  0xeb   : > { %s2891_s17 = sadd.s32 (!%p2890_p8), 4294967294, %s3615_s25  ;;  %s3544_s27 = smov (!%p2890_p8), 4  }
  0xec   : > { %594 = sbr.rel (%p2890_p8) target bundleno = 379 (0x17b), region = 48  ;;  %s2892_s19 = sshll.u32 (!%p2890_p8), %s2891_s17, 4 }
  0xed   : > { %s597_s26 = scalar_lea.vmem (!%p2890_p8), %s3623_s7, %s2892_s19  ;;  %s3545_s25 = smov (!%p2890_p8), 8  }
  0xee   : > { %v599_v41 = vld [vmem:[%s597_s26 + $0x8] sm:$0xff] (!%p2890_p8)  ;;  %v598_v42 = vld [vmem:[%s597_s26] sm:$0xff] (!%p2890_p8)  ;;  %v600_v43 = vld [vmem:[%s597_s26 + $0x10] sm:$0xff] (!%p2890_p8) }
  0xef   : > { %v607_v44 = vrot.slane (!%p2890_p8), %v599_v41, 7  ;;  %v606_v45 = vrot.slane (!%p2890_p8), %v598_v42, 7  ;;  %v609_v46 = vrot.slane (!%p2890_p8), %v600_v43, 7  ;;  %v601_v47 = vld [vmem:[%s597_s26 + $0x18] sm:$0xff] (!%p2890_p8) }
  0xf0   : > { %v610_v48 = vrot.slane (!%p2890_p8), %v601_v47, 7 }
  0xf1   : > { %v620_v49 = vsel (!%p2890_p8), %vm285_vm0, %v607_v44, 0.0  ;;  %v618_v50 = vsel (!%p2890_p8), %vm285_vm0, 0.0, %v606_v45  ;;  %v619_v51 = vsel (!%p2890_p8), %vm285_vm0, 0.0, %v609_v46  ;;  %v608_v52 = vsel (!%p2890_p8), %vm285_vm0, %v606_v45, %v607_v44 }
  0xf2   : > { %634 = vrot.lane.b32.xlu1 (!%p2890_p8), %v620_v49, %s3544_s27  ;;  %630 = vrot.lane.b32.xlu0 (!%p2890_p8), %v618_v50, %s3544_s27  ;;  %622 = vst.msk [vmem:[#allocation2] sm:$0xff] (!%p2890_p8), %vm351_vm1, %v618_v50  ;;  %624 = vst.msk [vmem:[#allocation2 + $0x10] sm:$0xff] (!%p2890_p8), %vm351_vm1, %v619_v51  ;;  %v611_v53 = vsel (!%p2890_p8), %vm285_vm0, %v609_v46, %v610_v48  ;;  %v621_v54 = vsel (!%p2890_p8), %vm285_vm0, %v610_v48, 0.0 }
  0xf3   : > { %623 = vst.msk [vmem:[#allocation2 + $0x8] sm:$0xff] %vm351_vm1, %v608_v52  ;;  %625 = vst.msk [vmem:[#allocation2 + $0x18] sm:$0xff] %vm351_vm1, %v611_v53 }
  0xf6   : > { %636 = vrot.lane.b32.xlu1 %v619_v51, %s3544_s27  ;;  %632 = vrot.lane.b32.xlu0 %v608_v52, %s3544_s27 }
  0xfa   : > { %640 = vrot.lane.b32.xlu1 %v621_v54, %s3544_s27  ;;  %638 = vrot.lane.b32.xlu0 %v611_v53, %s3544_s27 }
  0xfe   : > { %656 = vrot.lane.b32.xlu1 %v608_v52, %s3545_s25  ;;  %654 = vrot.lane.b32.xlu0 %v618_v50, %s3545_s25 }
 0x102   : > { %660 = vrot.lane.b32.xlu1 %v619_v51, %s3545_s25  ;;  %658 = vrot.lane.b32.xlu0 %v620_v49, %s3545_s25 }
 0x106   : > { %664 = vrot.lane.b32.xlu1 %v621_v54, %s3545_s25  ;;  %662 = vrot.lane.b32.xlu0 %v611_v53, %s3545_s25 }
 0x164   : > { %v635_v55 = vpop.permute.xlu1 %634  ;;  %v631_v56 = vpop.permute.xlu0 %630 }
 0x165   : > { %650 = vst.msk [vmem:[#allocation2 + $0xf] sm:$0x1] %vm460_vm2, %v635_v55 }
 0x166   : > { %648 = vst.msk [vmem:[#allocation2 - $0x1] sm:$0xfe] %vm456_vm3, %v631_v56 }
 0x168   : > { %v637_v57 = vpop.permute.xlu1 %636  ;;  %v633_v58 = vpop.permute.xlu0 %632 }
 0x169   : > { %651 = vst.msk [vmem:[#allocation2 + $0xf] sm:$0xfe] %vm456_vm3, %v637_v57 }
 0x16a   : > { %649 = vst.msk [vmem:[#allocation2 + $0x7] sm:$0xff] %vm458_vm4, %v633_v58 }
 0x16c   : > { %v641_v59 = vpop.permute.xlu1 %640  ;;  %v639_v60 = vpop.permute.xlu0 %638 }
 0x16d   : > { %653 = vst.msk [vmem:[#allocation2 + $0x1f] sm:$0x1] %vm460_vm2, %v641_v59 }
 0x16e   : > { %652 = vst.msk [vmem:[#allocation2 + $0x17] sm:$0xff] %vm458_vm4, %v639_v60 }
 0x170   : > { %v657_v61 = vpop.permute.xlu1 %656  ;;  %v655_v62 = vpop.permute.xlu0 %654 }
 0x171   : > { %673 = vst.msk [vmem:[#allocation2 + $0x6] sm:$0xff] %vm557_vm5, %v657_v61 }
 0x172   : > { %672 = vst.msk [vmem:[#allocation2 - $0x2] sm:$0xfc] %vm555_vm6, %v655_v62 }
 0x174   : > { %v661_v63 = vpop.permute.xlu1 %660  ;;  %v659_v0 = vpop.permute.xlu0 %658 }
 0x175   : > { %675 = vst.msk [vmem:[#allocation2 + $0xe] sm:$0xfc] %vm555_vm6, %v661_v63 }
 0x176   : > { %674 = vst.msk [vmem:[#allocation2 + $0xe] sm:$0x3] %vm559_vm7, %v659_v0 }
 0x178   : > { %v665_v1 = vpop.permute.xlu1 %664  ;;  %v663_v2 = vpop.permute.xlu0 %662 }
 0x179   : > { %677 = vst.msk [vmem:[#allocation2 + $0x1e] sm:$0x3] %vm559_vm7, %v665_v1 }
 0x17a   : > { %676 = vst.msk [vmem:[#allocation2 + $0x16] sm:$0xff] %vm557_vm5, %v663_v2 }
 0x17b PF: > { %p2893_p9 = scmp.ne.s32.totalorder %s3523_s18, 1 }
 0x17c   : > { %vm683_vm9 = vcmask (!%p2893_p9), 97280   ;;  %v3546_v3 = vmov (!%p2893_p9), 0.0  }
 0x17d   : > { %681 = sbr.rel (%p2893_p9) target bundleno = 388 (0x184), region = 52  ;;  %684 = vst.msk [vmem:[#allocation2 + $0xa0] sm:$0xff] (!%p2893_p9), %vm683_vm9, %v3546_v3  ;;  %685 = vst.msk [vmem:[#allocation2 + $0xa8] sm:$0xff] (!%p2893_p9), %vm683_vm9, %v3546_v3 }
 0x17e   : > { %686 = vst.msk [vmem:[#allocation2 + $0xb0] sm:$0xff] (!%p2893_p9), %vm683_vm9, %v3546_v3  ;;  %687 = vst.msk [vmem:[#allocation2 + $0xb8] sm:$0xff] (!%p2893_p9), %vm683_vm9, %v3546_v3 }
 0x184 PF: > { %p2894_p10 = scmp.ge.s32.totalorder %s3523_s18, 1 }
 0x185   : > { %v2898_v4 = vld [vmem:[%s3626_s10 + $0x88] sm:$0xff] (!%p2894_p10)  ;;  %v2897_v5 = vld [vmem:[%s3626_s10 + $0x80] sm:$0xff] (!%p2894_p10)  ;;  %v2899_v6 = vld [vmem:[%s3626_s10 + $0x90] sm:$0xff] (!%p2894_p10)  ;;  %s3547_s28 = smov (!%p2894_p10), 4   ;;  %s3548_s29 = smov (!%p2894_p10), 8  }
 0x186   : > { %691 = sbr.rel (%p2894_p10) target bundleno = 530 (0x212), region = 56  ;;  %v704_v7 = vrot.slane (!%p2894_p10), %v2898_v4, 7  ;;  %v703_v8 = vrot.slane (!%p2894_p10), %v2897_v5, 7  ;;  %v706_v9 = vrot.slane (!%p2894_p10), %v2899_v6, 7  ;;  %v2900_v10 = vld [vmem:[%s3626_s10 + $0x98] sm:$0xff] (!%p2894_p10) }
 0x187   : > { %v707_v11 = vrot.slane (!%p2894_p10), %v2900_v10, 7 }
 0x188   : > { %v717_v12 = vsel (!%p2894_p10), %vm285_vm0, %v704_v7, 0.0  ;;  %v715_v13 = vsel (!%p2894_p10), %vm285_vm0, 0.0, %v703_v8  ;;  %v716_v14 = vsel (!%p2894_p10), %vm285_vm0, 0.0, %v706_v9  ;;  %v705_v15 = vsel (!%p2894_p10), %vm285_vm0, %v703_v8, %v704_v7 }
 0x189   : > { %732 = vrot.lane.b32.xlu1 (!%p2894_p10), %v717_v12, %s3547_s28  ;;  %728 = vrot.lane.b32.xlu0 (!%p2894_p10), %v715_v13, %s3547_s28  ;;  %720 = vst.msk [vmem:[#allocation2 + $0xa0] sm:$0xff] (!%p2894_p10), %vm351_vm1, %v715_v13  ;;  %722 = vst.msk [vmem:[#allocation2 + $0xb0] sm:$0xff] (!%p2894_p10), %vm351_vm1, %v716_v14  ;;  %v708_v16 = vsel (!%p2894_p10), %vm285_vm0, %v706_v9, %v707_v11  ;;  %v718_v17 = vsel (!%p2894_p10), %vm285_vm0, %v707_v11, 0.0 }
 0x18a   : > { %721 = vst.msk [vmem:[#allocation2 + $0xa8] sm:$0xff] (!%p2894_p10), %vm351_vm1, %v705_v15  ;;  %723 = vst.msk [vmem:[#allocation2 + $0xb8] sm:$0xff] (!%p2894_p10), %vm351_vm1, %v708_v16 }
 0x18d   : > { %734 = vrot.lane.b32.xlu1 %v716_v14, %s3547_s28  ;;  %730 = vrot.lane.b32.xlu0 %v705_v15, %s3547_s28 }
 0x191   : > { %738 = vrot.lane.b32.xlu1 %v718_v17, %s3547_s28  ;;  %736 = vrot.lane.b32.xlu0 %v708_v16, %s3547_s28 }
 0x195   : > { %754 = vrot.lane.b32.xlu1 %v705_v15, %s3548_s29  ;;  %752 = vrot.lane.b32.xlu0 %v715_v13, %s3548_s29 }
 0x199   : > { %758 = vrot.lane.b32.xlu1 %v716_v14, %s3548_s29  ;;  %756 = vrot.lane.b32.xlu0 %v717_v12, %s3548_s29 }
 0x19d   : > { %762 = vrot.lane.b32.xlu1 %v718_v17, %s3548_s29  ;;  %760 = vrot.lane.b32.xlu0 %v708_v16, %s3548_s29 }
 0x1fb   : > { %v733_v18 = vpop.permute.xlu1 %732  ;;  %v729_v19 = vpop.permute.xlu0 %728 }
 0x1fc   : > { %748 = vst.msk [vmem:[#allocation2 + $0xaf] sm:$0x1] %vm460_vm2, %v733_v18 }
 0x1fd   : > { %746 = vst.msk [vmem:[#allocation2 + $0x9f] sm:$0xfe] %vm456_vm3, %v729_v19 }
 0x1ff   : > { %v735_v20 = vpop.permute.xlu1 %734  ;;  %v731_v21 = vpop.permute.xlu0 %730 }
 0x200   : > { %749 = vst.msk [vmem:[#allocation2 + $0xaf] sm:$0xfe] %vm456_vm3, %v735_v20 }
 0x201   : > { %747 = vst.msk [vmem:[#allocation2 + $0xa7] sm:$0xff] %vm458_vm4, %v731_v21 }
 0x203   : > { %v739_v22 = vpop.permute.xlu1 %738  ;;  %v737_v23 = vpop.permute.xlu0 %736 }
 0x204   : > { %751 = vst.msk [vmem:[#allocation2 + $0xbf] sm:$0x1] %vm460_vm2, %v739_v22 }
 0x205   : > { %750 = vst.msk [vmem:[#allocation2 + $0xb7] sm:$0xff] %vm458_vm4, %v737_v23 }
 0x207   : > { %v755_v24 = vpop.permute.xlu1 %754  ;;  %v753_v25 = vpop.permute.xlu0 %752 }
 0x208   : > { %771 = vst.msk [vmem:[#allocation2 + $0xa6] sm:$0xff] %vm557_vm5, %v755_v24 }
 0x209   : > { %770 = vst.msk [vmem:[#allocation2 + $0x9e] sm:$0xfc] %vm555_vm6, %v753_v25 }
 0x20b   : > { %v759_v26 = vpop.permute.xlu1 %758  ;;  %v757_v27 = vpop.permute.xlu0 %756 }
 0x20c   : > { %773 = vst.msk [vmem:[#allocation2 + $0xae] sm:$0xfc] %vm555_vm6, %v759_v26 }
 0x20d   : > { %772 = vst.msk [vmem:[#allocation2 + $0xae] sm:$0x3] %vm559_vm7, %v757_v27 }
 0x20f   : > { %v763_v28 = vpop.permute.xlu1 %762  ;;  %v761_v29 = vpop.permute.xlu0 %760 }
 0x210   : > { %775 = vst.msk [vmem:[#allocation2 + $0xbe] sm:$0x3] %vm559_vm7, %v763_v28 }
 0x211   : > { %774 = vst.msk [vmem:[#allocation2 + $0xb6] sm:$0xff] %vm557_vm5, %v761_v29 }
 0x212 PF: > { %v2901_v30 = vld [vmem:[%s4526_s1 + $0x10] sm:$0xff]  ;;  %v2902_v31 = vld [vmem:[%s4526_s1 + $0x18] sm:$0xf]  ;;  %vm885_vm10 = vcmask 1043456   ;;  %vm3549_vm11 = vmmov 1   ;;  %vm824_vm13 = vcmask 97280  }
 0x213   : > { %v801_v32 = vld [vmem:[#allocation2 + $0x10] sm:$0xff]  ;;  %v3340_v33 = vpack.c.bf16 %v2902_v31, %v2901_v30  ;;  %vm3909_vm12 = vmpackc.low %vm885_vm10, %vm3549_vm11  ;;  %v798_v35 = vld [vmem:[%s4526_s1] sm:$0xff] }
 0x214   : > { %3158 = vmatprep.mubr.msk.f32.mxu0 %vm824_vm13, %v801_v32  ;;  %v799_v36 = vld [vmem:[%s4526_s1 + $0x8] sm:$0xf]  ;;  %v802_v38 = vld [vmem:[#allocation2 + $0x18] sm:$0xff]  ;;  %v3930_v39 = vld [vmem:[#allocation2 + $0x20] sm:$0xff] }
 0x215   : > { %3342 = vmatprep.subr.msk.bf16.mxu0 %vm3909_vm12, %v3340_v33  ;;  %v3346_v37 = vpack.c.bf16 %v799_v36, %v798_v35  ;;  %3376 = vmatprep.subr.msk.bf16.mxu1 %vm3909_vm12, %v3340_v33  ;;  %v2945_v40 = vld [vmem:[%s4526_s1 + $0x20] sm:$0xff]  ;;  %v2946_v41 = vld [vmem:[%s4526_s1 + $0x28] sm:$0xf]  ;;  %v805_v45 = vld [vmem:[#allocation2 + $0x30] sm:$0xff] }
 0x216   : > { %3345 = vmatpush3.bf16.msk.msra.mxu0 %vm3909_vm12, %v3340_v33  ;;  %3377 = vmatpush3.bf16.msk.msra.mxu1 %vm3909_vm12, %v3340_v33  ;;  %v804_v42 = vld [vmem:[#allocation2 + $0x28] sm:$0xff]  ;;  %v3352_v43 = vpack.c.bf16 %v2946_v41, %v2945_v40  ;;  %v3943_v44 = vld [vmem:[#allocation2 + $0x80] sm:$0xff]  ;;  %v3951_v47 = vld [vmem:[#allocation2 + $0x90] sm:$0xff] }
 0x217   : > { %3348 = vmatprep.subr.msk.bf16.mxu0 %vm3909_vm12, %v3346_v37  ;;  %v3945_v46 = vld [vmem:[#allocation2 + $0x88] sm:$0xff]  ;;  %3179 = vmatprep.mubr.msk.f32.mxu1 %vm824_vm13, %v3943_v44  ;;  %v806_v48 = vld [vmem:[#allocation2 + $0x38] sm:$0xff]  ;;  %v807_v49 = vld [vmem:[#allocation2 + $0x40] sm:$0xff] }
 0x218   : > { %v797_v50 = vld [vmem:[#allocation2 + $0x98] sm:$0xff]  ;;  %v1298_v51 = vld [vmem:[#allocation2 + $0xa0] sm:$0xff]  ;;  %v808_v52 = vld [vmem:[#allocation2 + $0x48] sm:$0xff] }
 0x219   : > { %3159 = vmatmul.mubr.msk.f32.vlgmr.msra.gmra.mrb[0].mxu0 %vm824_vm13, %v802_v38  ;;  %3180 = vmatmul.mubr.msk.f32.vlgmr.msra.gmra.mrb[0].mxu1 %vm824_vm13, %v3945_v46  ;;  %v809_v53 = vld [vmem:[#allocation2 + $0x50] sm:$0xff]  ;;  %v1299_v54 = vld [vmem:[#allocation2 + $0xa8] sm:$0xff]  ;;  %v810_v55 = vld [vmem:[#allocation2 + $0x58] sm:$0xff] }
 0x21a   : > { %3351 = vmatpush3.bf16.msk.msra.mxu0 %vm3909_vm12, %v3346_v37  ;;  %3161 = vmatprep.mubr.msk.f32.mxu0 %vm824_vm13, %v3930_v39  ;;  %v811_v56 = vld [vmem:[#allocation2 + $0x60] sm:$0xff]  ;;  %v812_v57 = vld [vmem:[#allocation2 + $0x68] sm:$0xff]  ;;  %v813_v58 = vld [vmem:[#allocation2 + $0x70] sm:$0xff] }
 0x21b   : > { %3354 = vmatprep.subr.msk.bf16.mxu0 %vm3909_vm12, %v3352_v43  ;;  %3182 = vmatprep.mubr.msk.f32.mxu1 %vm824_vm13, %v3951_v47  ;;  %v814_v59 = vld [vmem:[#allocation2 + $0x78] sm:$0xff]  ;;  %v778_v60 = vld [vmem:[#allocation2] sm:$0xff]  ;;  %v779_v61 = vld [vmem:[#allocation2 + $0x8] sm:$0xff] }
 0x21c   : > { %v1300_v62 = vld [vmem:[#allocation2 + $0xb0] sm:$0xff]  ;;  %v1301_v63 = vld [vmem:[#allocation2 + $0xb8] sm:$0xff]  ;;  %v4036_v6 = vld [vmem:[%s4528_s3] ss:$0 sm:$0xff] }
 0x21d   : > { %3162 = vmatmul.mubr.msk.f32.gmra.mrb[2].mxu0 %vm824_vm13, %v804_v42  ;;  %3183 = vmatmul.mubr.msk.f32.gmra.mrb[2].mxu1 %vm824_vm13, %v797_v50  ;;  %v4041_v7 = vld [vmem:[%s4528_s3 + $0x1] ss:$0 sm:$0xff] }
 0x21e   : > { %3164 = vmatprep.mubr.msk.f32.mxu0 %vm824_vm13, %v805_v45  ;;  %3185 = vmatprep.mubr.msk.f32.mxu1 %vm824_vm13, %v1298_v51 }
 0x221   : > { %3165 = vmatmul.mubr.msk.f32.gmra.mrb[4].mxu0 %vm824_vm13, %v806_v48  ;;  %3186 = vmatmul.mubr.msk.f32.gmra.mrb[4].mxu1 %vm824_vm13, %v1299_v54 }
 0x222   : > { %3167 = vmatprep.mubr.msk.f32.mxu0 %vm824_vm13, %v807_v49 }
 0x225   : > { %3168 = vmatmul.mubr.msk.f32.gmra.mrb[6].mxu0 %vm824_vm13, %v808_v52 }
 0x226   : > { %3170 = vmatprep.mubr.msk.f32.mxu0 %vm824_vm13, %v809_v53 }
 0x229   : > { %3171 = vmatmul.mubr.msk.f32.gmra.mrb[8].mxu0 %vm824_vm13, %v810_v55 }
 0x22a   : > { %3173 = vmatprep.mubr.msk.f32.mxu0 %vm824_vm13, %v811_v56 }
 0x22d   : > { %3174 = vmatmul.mubr.msk.f32.gmra.mrb[10].mxu0 %vm824_vm13, %v812_v57 }
 0x22e   : > { %3176 = vmatprep.mubr.msk.f32.mxu0 %vm824_vm13, %v813_v58 }
 0x231   : > { %3177 = vmatmul.mubr.msk.f32.gmra.mrb[12].mxu0 %vm824_vm13, %v814_v59 }
 0x232   : > { %3192 = vmatprep.mubr.msk.f32.mxu0 %vm824_vm13, %v778_v60 }
 0x235   : > { %3193 = vmatmul.mubr.msk.f32.vlgmr.msra.gmra.mrb[0].mxu0 %vm824_vm13, %v779_v61 }
 0x236   : > { %3357 = vmatpush3.bf16.msk.msra.mxu0 %vm3909_vm12, %v3352_v43  ;;  %3195 = vmatprep.mubr.msk.f32.mxu0 %vm824_vm13, %v801_v32 }
 0x239   : > { %3196 = vmatmul.mubr.msk.f32.gmra.mrb[2].mxu0 %vm824_vm13, %v802_v38 }
 0x23a   : > { %3198 = vmatprep.mubr.msk.f32.mxu0 %vm824_vm13, %v3930_v39 }
 0x23d   : > { %3199 = vmatmul.mubr.msk.f32.gmra.mrb[4].mxu0 %vm824_vm13, %v804_v42 }
 0x23e   : > { %3201 = vmatprep.mubr.msk.f32.mxu0 %vm824_vm13, %v805_v45 }
 0x241   : > { %3202 = vmatmul.mubr.msk.f32.gmra.mrb[6].mxu0 %vm824_vm13, %v806_v48 }
 0x242   : > { %3204 = vmatprep.mubr.msk.f32.mxu0 %vm824_vm13, %v807_v49 }
 0x245   : > { %3205 = vmatmul.mubr.msk.f32.gmra.mrb[8].mxu0 %vm824_vm13, %v808_v52 }
 0x246   : > { %3207 = vmatprep.mubr.msk.f32.mxu0 %vm824_vm13, %v809_v53 }
 0x249   : > { %3208 = vmatmul.mubr.msk.f32.gmra.mrb[10].mxu0 %vm824_vm13, %v810_v55 }
 0x24a   : > { %3210 = vmatprep.mubr.msk.f32.mxu0 %vm824_vm13, %v811_v56 }
 0x24d   : > { %3211 = vmatmul.mubr.msk.f32.gmra.mrb[12].mxu0 %vm824_vm13, %v812_v57 }
 0x24e   : > { %3213 = vmatprep.mubr.msk.f32.mxu0 %vm824_vm13, %v813_v58 }
 0x251   : > { %3214 = vmatmul.mubr.msk.f32.gmra.mrb[14].mxu0 %vm824_vm13, %v814_v59 }
 0x252   : > { %3216 = vmatprep.mubr.msk.f32.mxu0 %vm824_vm13, %v3943_v44 }
 0x255   : > { %3217 = vmatmul.mubr.msk.f32.gmra.mrb[16].mxu0 %vm824_vm13, %v3945_v46 }
 0x256   : > { %3219 = vmatprep.mubr.msk.f32.mxu0 %vm824_vm13, %v3951_v47 }
 0x259   : > { %3220 = vmatmul.mubr.msk.f32.gmra.mrb[18].mxu0 %vm824_vm13, %v797_v50 }
 0x25a   : > { %3226 = vmatprep.mubr.msk.f32.mxu0 %vm824_vm13, %v3930_v39 }
 0x25d   : > { %3227 = vmatmul.mubr.msk.f32.vlgmr.msra.gmra.mrb[0].mxu0 %vm824_vm13, %v804_v42 }
 0x25e   : > { %3229 = vmatprep.mubr.msk.f32.mxu0 %vm824_vm13, %v805_v45 }
 0x261   : > { %3230 = vmatmul.mubr.msk.f32.gmra.mrb[2].mxu0 %vm824_vm13, %v806_v48 }
 0x262   : > { %3232 = vmatprep.mubr.msk.f32.mxu0 %vm824_vm13, %v807_v49 }
 0x265   : > { %3233 = vmatmul.mubr.msk.f32.gmra.mrb[4].mxu0 %vm824_vm13, %v808_v52 }
 0x266   : > { %3235 = vmatprep.mubr.msk.f32.mxu0 %vm824_vm13, %v809_v53 }
 0x269   : > { %3236 = vmatmul.mubr.msk.f32.gmra.mrb[6].mxu0 %vm824_vm13, %v810_v55 }
 0x26a   : > { %3238 = vmatprep.mubr.msk.f32.mxu0 %vm824_vm13, %v811_v56 }
 0x26d   : > { %3239 = vmatmul.mubr.msk.f32.gmra.mrb[8].mxu0 %vm824_vm13, %v812_v57 }
 0x26e   : > { %3241 = vmatprep.mubr.msk.f32.mxu0 %vm824_vm13, %v813_v58 }
 0x271   : > { %3242 = vmatmul.mubr.msk.f32.gmra.mrb[10].mxu0 %vm824_vm13, %v814_v59 }
 0x272   : > { %3244 = vmatprep.mubr.msk.f32.mxu0 %vm824_vm13, %v3943_v44 }
 0x275   : > { %3245 = vmatmul.mubr.msk.f32.gmra.mrb[12].mxu0 %vm824_vm13, %v3945_v46 }
 0x276   : > { %3247 = vmatprep.mubr.msk.f32.mxu0 %vm824_vm13, %v3951_v47 }
 0x279   : > { %3248 = vmatmul.mubr.msk.f32.gmra.mrb[14].mxu0 %vm824_vm13, %v797_v50 }
 0x27a   : > { %3250 = vmatprep.mubr.msk.f32.mxu0 %vm824_vm13, %v1298_v51 }
 0x27d   : > { %3251 = vmatmul.mubr.msk.f32.gmra.mrb[16].mxu0 %vm824_vm13, %v1299_v54 }
 0x27e   : > { %3253 = vmatprep.mubr.msk.f32.mxu0 %vm824_vm13, %v1300_v62 }
 0x281   : > { %3254 = vmatmul.mubr.msk.f32.gmra.mrb[18].mxu0 %vm824_vm13, %v1301_v63 }
 0x2ec   : > { %v4021_v0 = vpop.f32.mrb[0].mxu1 }
 0x2ed   : > { %v4023_v1 = vpop.f32.mrb[1].mxu1 }
 0x2f0   : > { %v4025_v2 = vpop.f32.mrb[2].mxu1 }
 0x2f1   : > { %v4027_v3 = vpop.f32.mrb[3].mxu1 }
 0x2f4   : > { %v4029_v4 = vpop.f32.mrb[4].mxu1 }
 0x2f5   : > { %v4031_v5 = vpop.f32.mrb[5].mxu1 }
 0x330   : > { %v3228_v8 = vpop.f32.mrb[0].mxu0 }
 0x331   : > { %v1558_v9 = vmul.f32 %v3228_v8, %v4036_v6  ;;  %v1434_v10 = vpop.f32.mrb[1].mxu0 }
 0x332   : > { %v1557_v11 = vmul.f32 %v4036_v6, %v1434_v10 }
 0x333   : > { %v1582_v12 = vadd.f32 %v4041_v7, %v1558_v9 }
 0x334   : > { %v1581_v13 = vadd.f32 %v4041_v7, %v1557_v11  ;;  %v3231_v14 = vpop.f32.mrb[2].mxu0 }
 0x335   : > { %v1560_v15 = vmul.f32 %v3231_v14, %v4036_v6  ;;  %v1444_v16 = vpop.f32.mrb[3].mxu0  ;;  %v1602_v17 = vmax.f32 %v1582_v12, 0.0 }
 0x336   : > { %v1601_v18 = vmax.f32 %v1581_v13, 0.0  ;;  %v1559_v19 = vmul.f32 %v4036_v6, %v1444_v16 }
 0x337   : > { %v1584_v20 = vadd.f32 %v4041_v7, %v1560_v15  ;;  %v1642_v21 = vrot.slane %v1602_v17, 7 }
 0x338   : > { %v1641_v22 = vrot.slane %v1601_v18, 7  ;;  %v1583_v23 = vadd.f32 %v4041_v7, %v1559_v19  ;;  %v3234_v24 = vpop.f32.mrb[4].mxu0 }
 0x339   : > { %v1562_v25 = vmul.f32 %v3234_v24, %v4036_v6  ;;  %v1454_v26 = vpop.f32.mrb[5].mxu0  ;;  %v1711_v27 = vsel %vm285_vm0, %v1642_v21, 0.0  ;;  %v1604_v28 = vmax.f32 %v1584_v20, 0.0 }
 0x33a   : > { %v1603_v29 = vmax.f32 %v1583_v23, 0.0  ;;  %v1561_v30 = vmul.f32 %v4036_v6, %v1454_v26  ;;  %1885 = vrot.lane.b32.xlu0 %v1711_v27, %s3542_s16  ;;  %1765 = vrot.lane.b32.xlu1 %v1711_v27, %s3541_s15  ;;  %v1701_v31 = vsel %vm285_vm0, 0.0, %v1641_v22  ;;  %v1643_v32 = vsel %vm285_vm0, %v1641_v22, %v1642_v21 }
 0x33b   : > { %v1586_v33 = vadd.f32 %v4041_v7, %v1562_v25  ;;  %1721 = vst.msk [vmem:[#allocation2] sm:$0xff] %vm351_vm1, %v1701_v31  ;;  %1722 = vst.msk [vmem:[#allocation2 + $0x8] sm:$0xff] %vm351_vm1, %v1643_v32  ;;  %v1645_v35 = vrot.slane %v1604_v28, 7 }
 0x33c   : > { %v1644_v36 = vrot.slane %v1603_v29, 7  ;;  %v1585_v37 = vadd.f32 %v4041_v7, %v1561_v30  ;;  %v3237_v38 = vpop.f32.mrb[6].mxu0 }
 0x33d   : > { %v1606_v39 = vmax.f32 %v1586_v33, 0.0  ;;  %v1564_v40 = vmul.f32 %v3237_v38, %v4036_v6  ;;  %v1464_v41 = vpop.f32.mrb[7].mxu0  ;;  %v1712_v53 = vsel %vm285_vm0, %v1645_v35, 0.0 }
 0x33e   : > { %v1605_v42 = vmax.f32 %v1585_v37, 0.0  ;;  %v1563_v43 = vmul.f32 %v4036_v6, %v1464_v41  ;;  %1761 = vrot.lane.b32.xlu0 %v1701_v31, %s3541_s15  ;;  %1883 = vrot.lane.b32.xlu1 %v1643_v32, %s3542_s16  ;;  %v4067_v44 = vsel %vm285_vm0, 0.0, %v1644_v36  ;;  %v1646_v45 = vsel %vm285_vm0, %v1644_v36, %v1645_v35 }
 0x33f   : > { %v4070_v46 = vrot.slane %v1606_v39, 7  ;;  %v1588_v47 = vadd.f32 %v4041_v7, %v1564_v40  ;;  %1723 = vst.msk [vmem:[#allocation2 + $0x10] sm:$0xff] %vm351_vm1, %v4067_v44  ;;  %1724 = vst.msk [vmem:[#allocation2 + $0x18] sm:$0xff] %vm351_vm1, %v1646_v45 }
 0x340   : > { %v1647_v48 = vrot.slane %v1605_v42, 7  ;;  %v1587_v49 = vadd.f32 %v4041_v7, %v1563_v43  ;;  %v3240_v50 = vpop.f32.mrb[8].mxu0 }
 0x341   : > { %v1566_v51 = vmul.f32 %v3240_v50, %v4036_v6  ;;  %v1474_v52 = vpop.f32.mrb[9].mxu0  ;;  %v1608_v54 = vmax.f32 %v1588_v47, 0.0 }
 0x342   : > { %v1607_v55 = vmax.f32 %v1587_v49, 0.0  ;;  %v1565_v56 = vmul.f32 %v4036_v6, %v1474_v52  ;;  %1771 = vrot.lane.b32.xlu1 %v1712_v53, %s3541_s15  ;;  %1763 = vrot.lane.b32.xlu0 %v1643_v32, %s3541_s15  ;;  %v4084_v57 = vsel %vm285_vm0, %v1647_v48, %v4070_v46  ;;  %v4087_v58 = vsel %vm285_vm0, 0.0, %v1647_v48 }
 0x343   : > { %v1590_v59 = vadd.f32 %v4041_v7, %v1566_v51  ;;  %1726 = vst.msk [vmem:[#allocation2 + $0x28] sm:$0xff] %vm351_vm1, %v4084_v57  ;;  %v4092_v60 = vrot.slane %v1608_v54, 7  ;;  %1725 = vst.msk [vmem:[#allocation2 + $0x20] sm:$0xff] %vm351_vm1, %v4087_v58 }
 0x344   : > { %v1650_v61 = vrot.slane %v1607_v55, 7  ;;  %v1589_v62 = vadd.f32 %v4041_v7, %v1565_v56  ;;  %v3243_v63 = vpop.f32.mrb[10].mxu0 }
 0x345   : > { %v1610_v8 = vmax.f32 %v1590_v59, 0.0  ;;  %v1568_v9 = vmul.f32 %v3243_v63, %v4036_v6  ;;  %v1484_v10 = vpop.f32.mrb[11].mxu0 }
 0x346   : > { %v1609_v11 = vmax.f32 %v1589_v62, 0.0  ;;  %v1567_v12 = vmul.f32 %v4036_v6, %v1484_v10  ;;  %1891 = vrot.lane.b32.xlu1 %v1712_v53, %s3542_s16  ;;  %1881 = vrot.lane.b32.xlu0 %v1701_v31, %s3542_s16  ;;  %v4102_v13 = vsel %vm285_vm0, 0.0, %v1650_v61  ;;  %v4106_v14 = vsel %vm285_vm0, %v1650_v61, %v4092_v60 }
 0x347   : > { %v4108_v15 = vrot.slane %v1610_v8, 7  ;;  %v1592_v16 = vadd.f32 %v4041_v7, %v1568_v9  ;;  %1727 = vst.msk [vmem:[#allocation2 + $0x30] sm:$0xff] %vm351_vm1, %v4102_v13  ;;  %1728 = vst.msk [vmem:[#allocation2 + $0x38] sm:$0xff] %vm351_vm1, %v4106_v14 }
 0x348   : > { %v1653_v17 = vrot.slane %v1609_v11, 7  ;;  %v1591_v18 = vadd.f32 %v4041_v7, %v1567_v12  ;;  %v3246_v19 = vpop.f32.mrb[12].mxu0 }
 0x349   : > { %v1570_v20 = vmul.f32 %v3246_v19, %v4036_v6  ;;  %v1494_v21 = vpop.f32.mrb[13].mxu0  ;;  %v1612_v22 = vmax.f32 %v1592_v16, 0.0  ;;  %v1714_v16 = vsel %vm285_vm0, %v4092_v60, 0.0 }
 0x34a   : > { %v1611_v23 = vmax.f32 %v1591_v18, 0.0  ;;  %v1569_v24 = vmul.f32 %v4036_v6, %v1494_v21  ;;  %1767 = vrot.lane.b32.xlu1 %v4067_v44, %s3541_s15  ;;  %1769 = vrot.lane.b32.xlu0 %v1646_v45, %s3541_s15  ;;  %v4123_v25 = vsel %vm285_vm0, %v1653_v17, %v4108_v15  ;;  %v4126_v26 = vsel %vm285_vm0, 0.0, %v1653_v17 }
 0x34b   : > { %v1594_v27 = vadd.f32 %v4041_v7, %v1570_v20  ;;  %1730 = vst.msk [vmem:[#allocation2 + $0x48] sm:$0xff] %vm351_vm1, %v4123_v25  ;;  %v4131_v28 = vrot.slane %v1612_v22, 7  ;;  %1729 = vst.msk [vmem:[#allocation2 + $0x40] sm:$0xff] %vm351_vm1, %v4126_v26 }
 0x34c   : > { %v1656_v29 = vrot.slane %v1611_v23, 7  ;;  %v1593_v30 = vadd.f32 %v4041_v7, %v1569_v24  ;;  %v3249_v31 = vpop.f32.mrb[14].mxu0 }
 0x34d   : > { %v1614_v32 = vmax.f32 %v1594_v27, 0.0  ;;  %v3378_v33 = vadd.f32 %v3249_v31, %v4021_v0  ;;  %v1504_v35 = vpop.f32.mrb[15].mxu0  ;;  %v1716_v24 = vsel %vm285_vm0, %v4131_v28, 0.0 }
 0x34e   : > { %v1613_v36 = vmax.f32 %v1593_v30, 0.0  ;;  %v3379_v37 = vadd.f32 %v1504_v35, %v4023_v1  ;;  %1887 = vrot.lane.b32.xlu1 %v4067_v44, %s3542_s16  ;;  %1889 = vrot.lane.b32.xlu0 %v1646_v45, %s3542_s16  ;;  %v4142_v38 = vsel %vm285_vm0, 0.0, %v1656_v29  ;;  %v4146_v39 = vsel %vm285_vm0, %v1656_v29, %v4131_v28 }
 0x34f   : > { %v4148_v40 = vrot.slane %v1614_v32, 7  ;;  %v1572_v0 = vmul.f32 %v3378_v33, %v4036_v6  ;;  %1731 = vst.msk [vmem:[#allocation2 + $0x50] sm:$0xff] %vm351_vm1, %v4142_v38  ;;  %1732 = vst.msk [vmem:[#allocation2 + $0x58] sm:$0xff] %vm351_vm1, %v4146_v39  ;;  %v1713_v45 = vsel %vm285_vm0, %v4070_v46, 0.0 }
 0x350   : > { %v1659_v1 = vrot.slane %v1613_v36, 7  ;;  %v1571_v41 = vmul.f32 %v3379_v37, %v4036_v6  ;;  %v3252_v42 = vpop.f32.mrb[16].mxu0 }
 0x351   : > { %v3380_v43 = vadd.f32 %v3252_v42, %v4025_v2  ;;  %v1514_v44 = vpop.f32.mrb[17].mxu0  ;;  %v1596_v47 = vadd.f32 %v4041_v7, %v1572_v0 }
 0x352   : > { %v1595_v48 = vadd.f32 %v4041_v7, %v1571_v41  ;;  %v3381_v49 = vadd.f32 %v1514_v44, %v4027_v3  ;;  %1775 = vrot.lane.b32.xlu1 %v4084_v57, %s3541_s15  ;;  %1777 = vrot.lane.b32.xlu0 %v1713_v45, %s3541_s15  ;;  %v4167_v50 = vsel %vm285_vm0, %v1659_v1, %v4148_v40  ;;  %v4170_v2 = vsel %vm285_vm0, 0.0, %v1659_v1 }
 0x353   : > { %v1574_v46 = vmul.f32 %v3380_v43, %v4036_v6  ;;  %1734 = vst.msk [vmem:[#allocation2 + $0x68] sm:$0xff] %vm351_vm1, %v4167_v50  ;;  %v1616_v51 = vmax.f32 %v1596_v47, 0.0  ;;  %1733 = vst.msk [vmem:[#allocation2 + $0x60] sm:$0xff] %vm351_vm1, %v4170_v2 }
 0x354   : > { %v1573_v3 = vmul.f32 %v3381_v49, %v4036_v6  ;;  %v3255_v52 = vpop.f32.mrb[18].mxu0  ;;  %v1615_v53 = vmax.f32 %v1595_v48, 0.0 }
 0x355   : > { %v1598_v54 = vadd.f32 %v4041_v7, %v1574_v46  ;;  %v3382_v55 = vadd.f32 %v3255_v52, %v4029_v4  ;;  %v1524_v56 = vpop.f32.mrb[19].mxu0  ;;  %v1663_v59 = vrot.slane %v1616_v51, 7 }
 0x356   : > { %v1597_v61 = vadd.f32 %v4041_v7, %v1573_v3  ;;  %v3383_v62 = vadd.f32 %v1524_v56, %v4031_v5  ;;  %1895 = vrot.lane.b32.xlu1 %v4084_v57, %s3542_s16  ;;  %1897 = vrot.lane.b32.xlu0 %v1713_v45, %s3542_s16  ;;  %v1662_v63 = vrot.slane %v1615_v53, 7 }
 0x357   : > { %v1576_v8 = vmul.f32 %v3382_v55, %v4036_v6  ;;  %v1618_v9 = vmax.f32 %v1598_v54, 0.0 }
 0x358   : > { %v1575_v10 = vmul.f32 %v3383_v62, %v4036_v6  ;;  %v1708_v11 = vsel %vm285_vm0, 0.0, %v1662_v63  ;;  %v1664_v4 = vsel %vm285_vm0, %v1662_v63, %v1663_v59  ;;  %v1617_v12 = vmax.f32 %v1597_v61, 0.0 }
 0x359   : > { %1735 = vst.msk [vmem:[#allocation2 + $0x70] sm:$0xff] %vm351_vm1, %v1708_v11  ;;  %1736 = vst.msk [vmem:[#allocation2 + $0x78] sm:$0xff] %vm351_vm1, %v1664_v4  ;;  %v1666_v5 = vrot.slane %v1618_v9, 7  ;;  %v1600_v57 = vadd.f32 %v4041_v7, %v1576_v8 }
 0x35a   : > { %v1599_v17 = vadd.f32 %v4041_v7, %v1575_v10  ;;  %1783 = vrot.lane.b32.xlu1 %v1714_v16, %s3541_s15  ;;  %1773 = vrot.lane.b32.xlu0 %v4087_v58, %s3541_s15  ;;  %v1665_v6 = vrot.slane %v1617_v12, 7 }
 0x35b   : > { %v1620_v18 = vmax.f32 %v1600_v57, 0.0 }
 0x35c   : > { %v1667_v19 = vsel %vm285_vm0, %v1665_v6, %v1666_v5  ;;  %v1709_v60 = vsel %vm285_vm0, 0.0, %v1665_v6  ;;  %v1619_v20 = vmax.f32 %v1599_v17, 0.0 }
 0x35d   : > { %1738 = vst.msk [vmem:[#allocation2 + $0x88] sm:$0xff] %vm351_vm1, %v1667_v19  ;;  %v1669_v21 = vrot.slane %v1620_v18, 7  ;;  %1737 = vst.msk [vmem:[#allocation2 + $0x80] sm:$0xff] %vm351_vm1, %v1709_v60 }
 0x35e   : > { %1903 = vrot.lane.b32.xlu1 %v1714_v16, %s3542_s16  ;;  %1893 = vrot.lane.b32.xlu0 %v4087_v58, %s3542_s16  ;;  %v1668_v7 = vrot.slane %v1619_v20, 7  ;;  %v1715_v58 = vsel %vm285_vm0, %v4108_v15, 0.0  ;;  %v1719_v15 = vsel %vm285_vm0, %v1666_v5, 0.0 }
 0x360   : > { %v1710_v22 = vsel %vm285_vm0, 0.0, %v1668_v7  ;;  %v1670_v23 = vsel %vm285_vm0, %v1668_v7, %v1669_v21 }
 0x361   : > { %1739 = vst.msk [vmem:[#allocation2 + $0x90] sm:$0xff] %vm351_vm1, %v1710_v22  ;;  %1740 = vst.msk [vmem:[#allocation2 + $0x98] sm:$0xff] %vm351_vm1, %v1670_v23 }
 0x362   : > { %1779 = vrot.lane.b32.xlu1 %v4102_v13, %s3541_s15  ;;  %1781 = vrot.lane.b32.xlu0 %v4106_v14, %s3541_s15 }
 0x366   : > { %1899 = vrot.lane.b32.xlu1 %v4102_v13, %s3542_s16  ;;  %1901 = vrot.lane.b32.xlu0 %v4106_v14, %s3542_s16  ;;  %v1717_v13 = vsel %vm285_vm0, %v4148_v40, 0.0  ;;  %v1718_v14 = vsel %vm285_vm0, %v1663_v59, 0.0 }
 0x36a   : > { %1787 = vrot.lane.b32.xlu1 %v4123_v25, %s3541_s15  ;;  %1789 = vrot.lane.b32.xlu0 %v1715_v58, %s3541_s15 }
 0x36e   : > { %1907 = vrot.lane.b32.xlu1 %v4123_v25, %s3542_s16  ;;  %1909 = vrot.lane.b32.xlu0 %v1715_v58, %s3542_s16  ;;  %v1720_v25 = vsel %vm285_vm0, %v1669_v21, 0.0 }
 0x372   : > { %1795 = vrot.lane.b32.xlu1 %v1716_v24, %s3541_s15  ;;  %1785 = vrot.lane.b32.xlu0 %v4126_v26, %s3541_s15 }
 0x376   : > { %1915 = vrot.lane.b32.xlu1 %v1716_v24, %s3542_s16  ;;  %1905 = vrot.lane.b32.xlu0 %v4126_v26, %s3542_s16 }
 0x37a   : > { %1791 = vrot.lane.b32.xlu1 %v4142_v38, %s3541_s15  ;;  %1793 = vrot.lane.b32.xlu0 %v4146_v39, %s3541_s15 }
 0x37e   : > { %1911 = vrot.lane.b32.xlu1 %v4142_v38, %s3542_s16  ;;  %1913 = vrot.lane.b32.xlu0 %v4146_v39, %s3542_s16 }
 0x382   : > { %1799 = vrot.lane.b32.xlu1 %v4167_v50, %s3541_s15  ;;  %1801 = vrot.lane.b32.xlu0 %v1717_v13, %s3541_s15 }
 0x386   : > { %1919 = vrot.lane.b32.xlu1 %v4167_v50, %s3542_s16  ;;  %1921 = vrot.lane.b32.xlu0 %v1717_v13, %s3542_s16 }
 0x38a   : > { %1807 = vrot.lane.b32.xlu1 %v1718_v14, %s3541_s15  ;;  %1797 = vrot.lane.b32.xlu0 %v4170_v2, %s3541_s15 }
 0x38e   : > { %1927 = vrot.lane.b32.xlu1 %v1718_v14, %s3542_s16  ;;  %1917 = vrot.lane.b32.xlu0 %v4170_v2, %s3542_s16  ;;  %v3550_v14 = vmov (!%p2889_p7), 0.0  }
 0x392   : > { %1803 = vrot.lane.b32.xlu1 %v1708_v11, %s3541_s15  ;;  %1805 = vrot.lane.b32.xlu0 %v1664_v4, %s3541_s15 }
 0x396   : > { %1923 = vrot.lane.b32.xlu1 %v1708_v11, %s3542_s16  ;;  %1925 = vrot.lane.b32.xlu0 %v1664_v4, %s3542_s16 }
 0x39a   : > { %1811 = vrot.lane.b32.xlu1 %v1667_v19, %s3541_s15  ;;  %1813 = vrot.lane.b32.xlu0 %v1719_v15, %s3541_s15 }
 0x39e   : > { %1931 = vrot.lane.b32.xlu1 %v1667_v19, %s3542_s16  ;;  %1933 = vrot.lane.b32.xlu0 %v1719_v15, %s3542_s16 }
 0x3a2   : > { %1819 = vrot.lane.b32.xlu1 %v1720_v25, %s3541_s15  ;;  %1809 = vrot.lane.b32.xlu0 %v1709_v60, %s3541_s15 }
 0x3a6   : > { %1815 = vrot.lane.b32.xlu1 %v1710_v22, %s3541_s15  ;;  %1929 = vrot.lane.b32.xlu0 %v1709_v60, %s3542_s16 }
 0x3aa   : > { %1935 = vrot.lane.b32.xlu1 %v1710_v22, %s3542_s16  ;;  %1817 = vrot.lane.b32.xlu0 %v1670_v23, %s3541_s15 }
 0x3ac   : > { %v1886_v26 = vpop.permute.xlu0 %1885  ;;  %v1766_v27 = vpop.permute.xlu1 %1765 }
 0x3ad   : > { %1853 = vst.msk [vmem:[#allocation2 + $0xf] sm:$0x1] %vm460_vm2, %v1766_v27 }
 0x3ae   : > { %1939 = vrot.lane.b32.xlu1 %v1720_v25, %s3542_s16  ;;  %1937 = vrot.lane.b32.xlu0 %v1670_v23, %s3542_s16 }
 0x3b0   : > { %v1762_v28 = vpop.permute.xlu0 %1761  ;;  %v1884_v29 = vpop.permute.xlu1 %1883 }
 0x3b1   : > { %1851 = vst.msk [vmem:[#allocation2 - $0x1] sm:$0xfe] %vm456_vm3, %v1762_v28 }
 0x3b4   : > { %v1772_v30 = vpop.permute.xlu1 %1771  ;;  %v1764_v31 = vpop.permute.xlu0 %1763 }
 0x3b5   : > { %1856 = vst.msk [vmem:[#allocation2 + $0x1f] sm:$0x1] %vm460_vm2, %v1772_v30 }
 0x3b6   : > { %1852 = vst.msk [vmem:[#allocation2 + $0x7] sm:$0xff] %vm458_vm4, %v1764_v31 }
 0x3b7   : > { %1972 = vst.msk [vmem:[#allocation2 + $0x6] sm:$0xff] %vm557_vm5, %v1884_v29 }
 0x3b8   : > { %1973 = vst.msk [vmem:[#allocation2 + $0xe] sm:$0x3] %vm559_vm7, %v1886_v26  ;;  %v1892_v32 = vpop.permute.xlu1 %1891  ;;  %v1882_v33 = vpop.permute.xlu0 %1881 }
 0x3b9   : > { %1971 = vst.msk [vmem:[#allocation2 - $0x2] sm:$0xfc] %vm555_vm6, %v1882_v33 }
 0x3ba   : > { %2004 = vst.msk [vmem:[#allocation2] sm:$0xff] (!%p2889_p7), %vm824_vm13, %v3550_v14  ;;  %2005 = vst.msk [vmem:[#allocation2 + $0x8] sm:$0xff] (!%p2889_p7), %vm824_vm13, %v3550_v14 }
 0x3bc   : > { %v1768_v35 = vpop.permute.xlu1 %1767  ;;  %v1770_v36 = vpop.permute.xlu0 %1769 }
 0x3bd   : > { %1854 = vst.msk [vmem:[#allocation2 + $0xf] sm:$0xfe] %vm456_vm3, %v1768_v35 }
 0x3be   : > { %1855 = vst.msk [vmem:[#allocation2 + $0x17] sm:$0xff] %vm458_vm4, %v1770_v36 }
 0x3bf   : > { %1976 = vst.msk [vmem:[#allocation2 + $0x1e] sm:$0x3] %vm559_vm7, %v1892_v32 }
 0x3c0   : > { %v1888_v37 = vpop.permute.xlu1 %1887  ;;  %v1890_v38 = vpop.permute.xlu0 %1889 }
 0x3c1   : > { %1974 = vst.msk [vmem:[#allocation2 + $0xe] sm:$0xfc] %vm555_vm6, %v1888_v37 }
 0x3c2   : > { %1975 = vst.msk [vmem:[#allocation2 + $0x16] sm:$0xff] %vm557_vm5, %v1890_v38 }
 0x3c4   : > { %v1776_v39 = vpop.permute.xlu1 %1775  ;;  %v1778_v40 = vpop.permute.xlu0 %1777 }
 0x3c5   : > { %1858 = vst.msk [vmem:[#allocation2 + $0x27] sm:$0xff] %vm458_vm4, %v1776_v39 }
 0x3c6   : > { %1859 = vst.msk [vmem:[#allocation2 + $0x2f] sm:$0x1] %vm460_vm2, %v1778_v40 }
 0x3c8   : > { %v1896_v0 = vpop.permute.xlu1 %1895  ;;  %v1898_v1 = vpop.permute.xlu0 %1897 }
 0x3c9   : > { %1979 = vst.msk [vmem:[#allocation2 + $0x2e] sm:$0x3] %vm559_vm7, %v1898_v1 }
 0x3cc   : > { %v1784_v41 = vpop.permute.xlu1 %1783  ;;  %v1774_v42 = vpop.permute.xlu0 %1773 }
 0x3cd   : > { %1862 = vst.msk [vmem:[#allocation2 + $0x3f] sm:$0x1] %vm460_vm2, %v1784_v41 }
 0x3ce   : > { %1857 = vst.msk [vmem:[#allocation2 + $0x1f] sm:$0xfe] %vm456_vm3, %v1774_v42 }
 0x3cf   : > { %1978 = vst.msk [vmem:[#allocation2 + $0x26] sm:$0xff] %vm557_vm5, %v1896_v0 }
 0x3d0   : > { %v1904_v43 = vpop.permute.xlu1 %1903  ;;  %v1894_v44 = vpop.permute.xlu0 %1893 }
 0x3d1   : > { %1977 = vst.msk [vmem:[#allocation2 + $0x1e] sm:$0xfc] %vm555_vm6, %v1894_v44 }
 0x3d4   : > { %v1780_v45 = vpop.permute.xlu1 %1779  ;;  %v1782_v47 = vpop.permute.xlu0 %1781 }
 0x3d5   : > { %1860 = vst.msk [vmem:[#allocation2 + $0x2f] sm:$0xfe] %vm456_vm3, %v1780_v45 }
 0x3d6   : > { %1861 = vst.msk [vmem:[#allocation2 + $0x37] sm:$0xff] %vm458_vm4, %v1782_v47 }
 0x3d7   : > { %1982 = vst.msk [vmem:[#allocation2 + $0x3e] sm:$0x3] %vm559_vm7, %v1904_v43 }
 0x3d8   : > { %v1900_v48 = vpop.permute.xlu1 %1899  ;;  %v1902_v49 = vpop.permute.xlu0 %1901 }
 0x3d9   : > { %1980 = vst.msk [vmem:[#allocation2 + $0x2e] sm:$0xfc] %vm555_vm6, %v1900_v48 }
 0x3da   : > { %1981 = vst.msk [vmem:[#allocation2 + $0x36] sm:$0xff] %vm557_vm5, %v1902_v49 }
 0x3dc   : > { %v1788_v50 = vpop.permute.xlu1 %1787  ;;  %v1790_v2 = vpop.permute.xlu0 %1789 }
 0x3dd   : > { %1864 = vst.msk [vmem:[#allocation2 + $0x47] sm:$0xff] %vm458_vm4, %v1788_v50 }
 0x3de   : > { %1865 = vst.msk [vmem:[#allocation2 + $0x4f] sm:$0x1] %vm460_vm2, %v1790_v2 }
 0x3e0   : > { %v1908_v46 = vpop.permute.xlu1 %1907  ;;  %v1910_v51 = vpop.permute.xlu0 %1909 }
 0x3e1   : > { %1985 = vst.msk [vmem:[#allocation2 + $0x4e] sm:$0x3] %vm559_vm7, %v1910_v51 }
 0x3e4   : > { %v1796_v3 = vpop.permute.xlu1 %1795  ;;  %v1786_v52 = vpop.permute.xlu0 %1785 }
 0x3e5   : > { %1868 = vst.msk [vmem:[#allocation2 + $0x5f] sm:$0x1] %vm460_vm2, %v1796_v3 }
 0x3e6   : > { %1863 = vst.msk [vmem:[#allocation2 + $0x3f] sm:$0xfe] %vm456_vm3, %v1786_v52 }
 0x3e7   : > { %1984 = vst.msk [vmem:[#allocation2 + $0x46] sm:$0xff] %vm557_vm5, %v1908_v46 }
 0x3e8   : > { %v1916_v53 = vpop.permute.xlu1 %1915  ;;  %v1906_v54 = vpop.permute.xlu0 %1905 }
 0x3e9   : > { %1983 = vst.msk [vmem:[#allocation2 + $0x3e] sm:$0xfc] %vm555_vm6, %v1906_v54 }
 0x3ec   : > { %v1792_v55 = vpop.permute.xlu1 %1791  ;;  %v1794_v56 = vpop.permute.xlu0 %1793 }
 0x3ed   : > { %1866 = vst.msk [vmem:[#allocation2 + $0x4f] sm:$0xfe] %vm456_vm3, %v1792_v55 }
 0x3ee   : > { %1867 = vst.msk [vmem:[#allocation2 + $0x57] sm:$0xff] %vm458_vm4, %v1794_v56 }
 0x3ef   : > { %1988 = vst.msk [vmem:[#allocation2 + $0x5e] sm:$0x3] %vm559_vm7, %v1916_v53 }
 0x3f0   : > { %v1912_v59 = vpop.permute.xlu1 %1911  ;;  %v1914_v61 = vpop.permute.xlu0 %1913 }
 0x3f1   : > { %1986 = vst.msk [vmem:[#allocation2 + $0x4e] sm:$0xfc] %vm555_vm6, %v1912_v59 }
 0x3f2   : > { %1987 = vst.msk [vmem:[#allocation2 + $0x56] sm:$0xff] %vm557_vm5, %v1914_v61 }
 0x3f4   : > { %v1800_v62 = vpop.permute.xlu1 %1799  ;;  %v1802_v63 = vpop.permute.xlu0 %1801 }
 0x3f5   : > { %1870 = vst.msk [vmem:[#allocation2 + $0x67] sm:$0xff] %vm458_vm4, %v1800_v62 }
 0x3f6   : > { %1871 = vst.msk [vmem:[#allocation2 + $0x6f] sm:$0x1] %vm460_vm2, %v1802_v63 }
 0x3f8   : > { %v1920_v8 = vpop.permute.xlu1 %1919  ;;  %v1922_v9 = vpop.permute.xlu0 %1921 }
 0x3f9   : > { %1991 = vst.msk [vmem:[#allocation2 + $0x6e] sm:$0x3] %vm559_vm7, %v1922_v9 }
 0x3fc   : > { %v1808_v10 = vpop.permute.xlu1 %1807  ;;  %v1798_v11 = vpop.permute.xlu0 %1797 }
 0x3fd   : > { %1874 = vst.msk [vmem:[#allocation2 + $0x7f] sm:$0x1] %vm460_vm2, %v1808_v10 }
 0x3fe   : > { %1869 = vst.msk [vmem:[#allocation2 + $0x5f] sm:$0xfe] %vm456_vm3, %v1798_v11 }
 0x3ff   : > { %1990 = vst.msk [vmem:[#allocation2 + $0x66] sm:$0xff] %vm557_vm5, %v1920_v8 }
 0x400   : > { %v1928_v4 = vpop.permute.xlu1 %1927  ;;  %v1918_v12 = vpop.permute.xlu0 %1917 }
 0x401   : > { %1989 = vst.msk [vmem:[#allocation2 + $0x5e] sm:$0xfc] %vm555_vm6, %v1918_v12 }
 0x404   : > { %v1804_v16 = vpop.permute.xlu1 %1803  ;;  %v1806_v5 = vpop.permute.xlu0 %1805 }
 0x405   : > { %1872 = vst.msk [vmem:[#allocation2 + $0x6f] sm:$0xfe] %vm456_vm3, %v1804_v16 }
 0x406   : > { %1873 = vst.msk [vmem:[#allocation2 + $0x77] sm:$0xff] %vm458_vm4, %v1806_v5 }
 0x407   : > { %1994 = vst.msk [vmem:[#allocation2 + $0x7e] sm:$0x3] %vm559_vm7, %v1928_v4 }
 0x408   : > { %v1924_v57 = vpop.permute.xlu1 %1923  ;;  %v1926_v17 = vpop.permute.xlu0 %1925 }
 0x409   : > { %1992 = vst.msk [vmem:[#allocation2 + $0x6e] sm:$0xfc] %vm555_vm6, %v1924_v57 }
 0x40a   : > { %1993 = vst.msk [vmem:[#allocation2 + $0x76] sm:$0xff] %vm557_vm5, %v1926_v17 }
 0x40c   : > { %v1812_v6 = vpop.permute.xlu1 %1811  ;;  %v1814_v18 = vpop.permute.xlu0 %1813 }
 0x40d   : > { %1876 = vst.msk [vmem:[#allocation2 + $0x87] sm:$0xff] %vm458_vm4, %v1812_v6 }
 0x40e   : > { %1877 = vst.msk [vmem:[#allocation2 + $0x8f] sm:$0x1] %vm460_vm2, %v1814_v18 }
 0x410   : > { %v1932_v19 = vpop.permute.xlu1 %1931  ;;  %v1934_v60 = vpop.permute.xlu0 %1933 }
 0x411   : > { %1997 = vst.msk [vmem:[#allocation2 + $0x8e] sm:$0x3] %vm559_vm7, %v1934_v60 }
 0x414   : > { %v1820_v20 = vpop.permute.xlu1 %1819  ;;  %v1810_v21 = vpop.permute.xlu0 %1809 }
 0x415   : > { %1880 = vst.msk [vmem:[#allocation2 + $0x9f] sm:$0x1] %vm460_vm2, %v1820_v20 }
 0x416   : > { %1875 = vst.msk [vmem:[#allocation2 + $0x7f] sm:$0xfe] %vm456_vm3, %v1810_v21 }
 0x417   : > { %1996 = vst.msk [vmem:[#allocation2 + $0x86] sm:$0xff] %vm557_vm5, %v1932_v19 }
 0x418   : > { %v1816_v7 = vpop.permute.xlu1 %1815  ;;  %v1930_v22 = vpop.permute.xlu0 %1929 }
 0x419   : > { %1878 = vst.msk [vmem:[#allocation2 + $0x8f] sm:$0xfe] %vm456_vm3, %v1816_v7 }
 0x41a   : > { %1995 = vst.msk [vmem:[#allocation2 + $0x7e] sm:$0xfc] %vm555_vm6, %v1930_v22 }
 0x41c   : > { %v1936_v23 = vpop.permute.xlu1 %1935  ;;  %v1818_v58 = vpop.permute.xlu0 %1817  ;;  %2003 = sbr.rel (%p2889_p7) target bundleno = 1059 (0x423), region = 60 }
 0x41d   : > { %1998 = vst.msk [vmem:[#allocation2 + $0x8e] sm:$0xfc] %vm555_vm6, %v1936_v23 }
 0x41e   : > { %1879 = vst.msk [vmem:[#allocation2 + $0x97] sm:$0xff] %vm458_vm4, %v1818_v58 }
 0x420   : > { %v1940_v24 = vpop.permute.xlu1 %1939  ;;  %v1938_v13 = vpop.permute.xlu0 %1937 }
 0x421   : > { %2000 = vst.msk [vmem:[#allocation2 + $0x9e] sm:$0x3] %vm559_vm7, %v1940_v24 }
 0x422   : > { %1999 = vst.msk [vmem:[#allocation2 + $0x96] sm:$0xff] %vm557_vm5, %v1938_v13 }
 0x423 PF: > { %2008 = sbr.rel (%p2893_p9) target bundleno = 1066 (0x42a), region = 64  ;;  %v3551_v15 = vmov (!%p2893_p9), 0.0  }
 0x424   : > { %2010 = vst.msk [vmem:[#allocation2 + $0x90] sm:$0xff] (!%p2893_p9), %vm824_vm13, %v3551_v15  ;;  %2011 = vst.msk [vmem:[#allocation2 + $0x98] sm:$0xff] (!%p2893_p9), %vm824_vm13, %v3551_v15 }
 0x42a PF: > { %v2972_v25 = vld [vmem:[%s4527_s2 + $0x10] sm:$0xff]  ;;  %v2973_v26 = vld [vmem:[%s4527_s2 + $0x18] sm:$0xf]  ;;  %v2030_v29 = vld [vmem:[%s4527_s2] sm:$0xff] }
 0x42b   : > { %v2032_v27 = vld [vmem:[#allocation2 + $0x10] sm:$0xff]  ;;  %v3358_v28 = vpack.c.bf16 %v2973_v26, %v2972_v25  ;;  %v2031_v30 = vld [vmem:[%s4527_s2 + $0x8] sm:$0xf]  ;;  %v2033_v32 = vld [vmem:[#allocation2 + $0x18] sm:$0xff] }
 0x42c   : > { %3260 = vmatprep.mubr.msk.f32.mxu1 %vm824_vm13, %v2032_v27  ;;  %v3364_v31 = vpack.c.bf16 %v2031_v30, %v2030_v29  ;;  %v2034_v33 = vld [vmem:[#allocation2 + $0x20] sm:$0xff]  ;;  %v3009_v36 = vld [vmem:[%s4527_s2 + $0x28] sm:$0xf]  ;;  %v2036_v39 = vld [vmem:[#allocation2 + $0x30] sm:$0xff] }
 0x42d   : > { %3360 = vmatprep.subr.msk.bf16.mxu1 %vm3909_vm12, %v3358_v28  ;;  %v3008_v35 = vld [vmem:[%s4527_s2 + $0x20] sm:$0xff]  ;;  %v2035_v37 = vld [vmem:[#allocation2 + $0x28] sm:$0xff]  ;;  %v2037_v40 = vld [vmem:[#allocation2 + $0x38] sm:$0xff] }
 0x42e   : > { %3363 = vmatpush3.bf16.msk.msra.mxu1 %vm3909_vm12, %v3358_v28  ;;  %v3370_v38 = vpack.c.bf16 %v3009_v36, %v3008_v35  ;;  %v2038_v0 = vld [vmem:[#allocation2 + $0x40] sm:$0xff]  ;;  %v2039_v1 = vld [vmem:[#allocation2 + $0x48] sm:$0xff]  ;;  %v2040_v41 = vld [vmem:[#allocation2 + $0x50] sm:$0xff] }
 0x42f   : > { %3366 = vmatprep.subr.msk.bf16.mxu1 %vm3909_vm12, %v3364_v31  ;;  %v2041_v42 = vld [vmem:[#allocation2 + $0x58] sm:$0xff]  ;;  %v2042_v43 = vld [vmem:[#allocation2 + $0x60] sm:$0xff]  ;;  %v2043_v44 = vld [vmem:[#allocation2 + $0x68] sm:$0xff] }
 0x430   : > { %v2044_v45 = vld [vmem:[#allocation2 + $0x70] sm:$0xff]  ;;  %v2045_v47 = vld [vmem:[#allocation2 + $0x78] sm:$0xff]  ;;  %v2046_v48 = vld [vmem:[#allocation2 + $0x80] sm:$0xff] }
 0x431   : > { %3261 = vmatmul.mubr.msk.f32.vlgmr.msra.gmra.mrb[6].mxu1 %vm824_vm13, %v2033_v32  ;;  %v2047_v49 = vld [vmem:[#allocation2 + $0x88] sm:$0xff]  ;;  %v2014_v50 = vld [vmem:[#allocation2] sm:$0xff]  ;;  %v2457_v34 = vld [vmem:[#allocation2 + $0x90] sm:$0xff] }
 0x432   : > { %3369 = vmatpush3.bf16.msk.msra.mxu1 %vm3909_vm12, %v3364_v31  ;;  %3263 = vmatprep.mubr.msk.f32.mxu1 %vm824_vm13, %v2034_v33  ;;  %v2015_v2 = vld [vmem:[#allocation2 + $0x8] sm:$0xff]  ;;  %v2458_v46 = vld [vmem:[#allocation2 + $0x98] sm:$0xff]  ;;  %v4423_v51 = vld [vmem:[%s4529_s4] ss:$0 sm:$0xff] }
 0x433   : > { %3372 = vmatprep.subr.msk.bf16.mxu1 %vm3909_vm12, %v3370_v38  ;;  %v4428_v3 = vld [vmem:[%s4529_s4 + $0x1] ss:$0 sm:$0xff]  ;;  %v2715_v55 = vld [vmem:[%s3626_s10 + $0x8] sm:$0xff]  ;;  %v2717_v4 = vld [vmem:[%s3626_s10 + $0x18] sm:$0xff] }
 0x434   : > { %v2714_v61 = vld [vmem:[%s3626_s10] sm:$0xff]  ;;  %v2716_v57 = vld [vmem:[%s3626_s10 + $0x10] sm:$0xff]  ;;  %v2719_v7 = vld [vmem:[%s3626_s10 + $0x28] sm:$0xff] }
 0x435   : > { %3264 = vmatmul.mubr.msk.f32.gmra.mrb[8].mxu1 %vm824_vm13, %v2035_v37  ;;  %v2718_v24 = vld [vmem:[%s3626_s10 + $0x20] sm:$0xff]  ;;  %v2721_v29 = vld [vmem:[%s3626_s10 + $0x38] sm:$0xff] }
 0x436   : > { %3266 = vmatprep.mubr.msk.f32.mxu1 %vm824_vm13, %v2036_v39 }
 0x439   : > { %3267 = vmatmul.mubr.msk.f32.gmra.mrb[10].mxu1 %vm824_vm13, %v2037_v40 }
 0x43a   : > { %3269 = vmatprep.mubr.msk.f32.mxu1 %vm824_vm13, %v2038_v0 }
 0x43d   : > { %3270 = vmatmul.mubr.msk.f32.gmra.mrb[12].mxu1 %vm824_vm13, %v2039_v1 }
 0x43e   : > { %3272 = vmatprep.mubr.msk.f32.mxu1 %vm824_vm13, %v2040_v41 }
 0x441   : > { %3273 = vmatmul.mubr.msk.f32.gmra.mrb[14].mxu1 %vm824_vm13, %v2041_v42 }
 0x442   : > { %3275 = vmatprep.mubr.msk.f32.mxu1 %vm824_vm13, %v2042_v43 }
 0x445   : > { %3276 = vmatmul.mubr.msk.f32.gmra.mrb[16].mxu1 %vm824_vm13, %v2043_v44 }
 0x446   : > { %3278 = vmatprep.mubr.msk.f32.mxu1 %vm824_vm13, %v2044_v45 }
 0x449   : > { %3279 = vmatmul.mubr.msk.f32.gmra.mrb[18].mxu1 %vm824_vm13, %v2045_v47 }
 0x44a   : > { %3281 = vmatprep.mubr.msk.f32.mxu1 %vm824_vm13, %v2046_v48 }
 0x44d   : > { %3282 = vmatmul.mubr.msk.f32.gmra.mrb[20].mxu1 %vm824_vm13, %v2047_v49 }
 0x44e   : > { %3288 = vmatprep.mubr.msk.f32.mxu1 %vm824_vm13, %v2014_v50 }
 0x451   : > { %3289 = vmatmul.mubr.msk.f32.vlgmr.msra.gmra.mrb[6].mxu1 %vm824_vm13, %v2015_v2 }
 0x452   : > { %3375 = vmatpush3.bf16.msk.msra.mxu1 %vm3909_vm12, %v3370_v38  ;;  %3291 = vmatprep.mubr.msk.f32.mxu1 %vm824_vm13, %v2032_v27 }
 0x455   : > { %3292 = vmatmul.mubr.msk.f32.gmra.mrb[8].mxu1 %vm824_vm13, %v2033_v32 }
 0x456   : > { %3294 = vmatprep.mubr.msk.f32.mxu1 %vm824_vm13, %v2034_v33 }
 0x459   : > { %3295 = vmatmul.mubr.msk.f32.gmra.mrb[10].mxu1 %vm824_vm13, %v2035_v37 }
 0x45a   : > { %3297 = vmatprep.mubr.msk.f32.mxu1 %vm824_vm13, %v2036_v39 }
 0x45d   : > { %3298 = vmatmul.mubr.msk.f32.gmra.mrb[12].mxu1 %vm824_vm13, %v2037_v40 }
 0x45e   : > { %3300 = vmatprep.mubr.msk.f32.mxu1 %vm824_vm13, %v2038_v0 }
 0x461   : > { %3301 = vmatmul.mubr.msk.f32.gmra.mrb[14].mxu1 %vm824_vm13, %v2039_v1 }
 0x462   : > { %3303 = vmatprep.mubr.msk.f32.mxu1 %vm824_vm13, %v2040_v41 }
 0x465   : > { %3304 = vmatmul.mubr.msk.f32.gmra.mrb[16].mxu1 %vm824_vm13, %v2041_v42 }
 0x466   : > { %3306 = vmatprep.mubr.msk.f32.mxu1 %vm824_vm13, %v2042_v43 }
 0x469   : > { %3307 = vmatmul.mubr.msk.f32.gmra.mrb[18].mxu1 %vm824_vm13, %v2043_v44 }
 0x46a   : > { %3309 = vmatprep.mubr.msk.f32.mxu1 %vm824_vm13, %v2044_v45 }
 0x46d   : > { %3310 = vmatmul.mubr.msk.f32.gmra.mrb[20].mxu1 %vm824_vm13, %v2045_v47 }
 0x46e   : > { %3316 = vmatprep.mubr.msk.f32.mxu1 %vm824_vm13, %v2034_v33  ;;  %v2720_v33 = vld [vmem:[%s3626_s10 + $0x30] sm:$0xff] }
 0x471   : > { %3317 = vmatmul.mubr.msk.f32.vlgmr.msra.gmra.mrb[6].mxu1 %vm824_vm13, %v2035_v37 }
 0x472   : > { %3319 = vmatprep.mubr.msk.f32.mxu1 %vm824_vm13, %v2036_v39 }
 0x475   : > { %3320 = vmatmul.mubr.msk.f32.gmra.mrb[8].mxu1 %vm824_vm13, %v2037_v40 }
 0x476   : > { %3322 = vmatprep.mubr.msk.f32.mxu1 %vm824_vm13, %v2038_v0 }
 0x479   : > { %3323 = vmatmul.mubr.msk.f32.gmra.mrb[10].mxu1 %vm824_vm13, %v2039_v1  ;;  %v2723_v1 = vld [vmem:[%s3626_s10 + $0x48] sm:$0xff] }
 0x47a   : > { %3325 = vmatprep.mubr.msk.f32.mxu1 %vm824_vm13, %v2040_v41 }
 0x47d   : > { %3326 = vmatmul.mubr.msk.f32.gmra.mrb[12].mxu1 %vm824_vm13, %v2041_v42 }
 0x47e   : > { %3328 = vmatprep.mubr.msk.f32.mxu1 %vm824_vm13, %v2042_v43 }
 0x481   : > { %3329 = vmatmul.mubr.msk.f32.gmra.mrb[14].mxu1 %vm824_vm13, %v2043_v44  ;;  %v2722_v44 = vld [vmem:[%s3626_s10 + $0x40] sm:$0xff] }
 0x482   : > { %3331 = vmatprep.mubr.msk.f32.mxu1 %vm824_vm13, %v2044_v45 }
 0x485   : > { %3332 = vmatmul.mubr.msk.f32.gmra.mrb[16].mxu1 %vm824_vm13, %v2045_v47 }
 0x486   : > { %3334 = vmatprep.mubr.msk.f32.mxu1 %vm824_vm13, %v2046_v48 }
 0x489   : > { %3335 = vmatmul.mubr.msk.f32.gmra.mrb[18].mxu1 %vm824_vm13, %v2047_v49 }
 0x48a   : > { %3337 = vmatprep.mubr.msk.f32.mxu1 %vm824_vm13, %v2457_v34 }
 0x48d   : > { %3338 = vmatmul.mubr.msk.f32.gmra.mrb[20].mxu1 %vm824_vm13, %v2458_v46  ;;  %v2725_v46 = vld [vmem:[%s3626_s10 + $0x58] sm:$0xff] }
 0x544   : > { %v3318_v52 = vpop.f32.mrb[6].mxu1 }
 0x545   : > { %v2679_v53 = vmul.f32 %v3318_v52, %v4423_v51  ;;  %v2579_v54 = vpop.f32.mrb[7].mxu1 }
 0x546   : > { %v2678_v56 = vmul.f32 %v4423_v51, %v2579_v54 }
 0x547   : > { %v2699_v59 = vadd.f32 %v4428_v3, %v2679_v53 }
 0x548   : > { %v2698_v62 = vadd.f32 %v4428_v3, %v2678_v56  ;;  %v3321_v63 = vpop.f32.mrb[8].mxu1 }
 0x549   : > { %v2731_v8 = vadd.f32 %v2715_v55, %v2699_v59  ;;  %v2681_v9 = vmul.f32 %v3321_v63, %v4423_v51  ;;  %v2589_v10 = vpop.f32.mrb[9].mxu1  ;;  %v2724_v55 = vld [vmem:[%s3626_s10 + $0x50] sm:$0xff] }
 0x54a   : > { %v2730_v11 = vadd.f32 %v2714_v61, %v2698_v62  ;;  %v2680_v12 = vmul.f32 %v4423_v51, %v2589_v10  ;;  %v2727_v10 = vld [vmem:[%s3626_s10 + $0x68] sm:$0xff] }
 0x54b   : > { %v2747_v16 = vmax.f32 %v2731_v8, 0.0  ;;  %v2701_v5 = vadd.f32 %v4428_v3, %v2681_v9 }
 0x54c   : > { %v2746_v17 = vmax.f32 %v2730_v11, 0.0  ;;  %v2700_v6 = vadd.f32 %v4428_v3, %v2680_v12  ;;  %v3324_v18 = vpop.f32.mrb[10].mxu1 }
 0x54d   : > { %2763 = vst.msk [vmem:[%s3634_s14 + $0x8] sm:$0xff] %vm351_vm1, %v2747_v16  ;;  %v2733_v19 = vadd.f32 %v2717_v4, %v2701_v5  ;;  %v2683_v60 = vmul.f32 %v3324_v18, %v4423_v51  ;;  %v2599_v20 = vpop.f32.mrb[11].mxu1  ;;  %v2726_v16 = vld [vmem:[%s3626_s10 + $0x60] sm:$0xff] }
 0x54e   : > { %2762 = vst.msk [vmem:[%s3634_s14] sm:$0xff] %vm351_vm1, %v2746_v17  ;;  %v2732_v21 = vadd.f32 %v2716_v57, %v2700_v6  ;;  %v2682_v22 = vmul.f32 %v4423_v51, %v2599_v20  ;;  %v2729_v20 = vld [vmem:[%s3626_s10 + $0x78] sm:$0xff] }
 0x54f   : > { %v2749_v23 = vmax.f32 %v2733_v19, 0.0  ;;  %v2703_v58 = vadd.f32 %v4428_v3, %v2683_v60 }
 0x550   : > { %v2748_v13 = vmax.f32 %v2732_v21, 0.0  ;;  %v2702_v14 = vadd.f32 %v4428_v3, %v2682_v22  ;;  %v3327_v15 = vpop.f32.mrb[12].mxu1 }
 0x551   : > { %2765 = vst.msk [vmem:[%s3634_s14 + $0x18] sm:$0xff] %vm351_vm1, %v2749_v23  ;;  %v2735_v25 = vadd.f32 %v2719_v7, %v2703_v58  ;;  %v2685_v26 = vmul.f32 %v3327_v15, %v4423_v51  ;;  %v2609_v27 = vpop.f32.mrb[13].mxu1  ;;  %v2728_v23 = vld [vmem:[%s3626_s10 + $0x70] sm:$0xff] }
 0x552   : > { %2764 = vst.msk [vmem:[%s3634_s14 + $0x10] sm:$0xff] %vm351_vm1, %v2748_v13  ;;  %v2734_v28 = vadd.f32 %v2718_v24, %v2702_v14  ;;  %v2684_v30 = vmul.f32 %v4423_v51, %v2609_v27 }
 0x553   : > { %v2751_v31 = vmax.f32 %v2735_v25, 0.0  ;;  %v2705_v32 = vadd.f32 %v4428_v3, %v2685_v26 }
 0x554   : > { %v2750_v35 = vmax.f32 %v2734_v28, 0.0  ;;  %v2704_v36 = vadd.f32 %v4428_v3, %v2684_v30  ;;  %v3330_v37 = vpop.f32.mrb[14].mxu1 }
 0x555   : > { %2767 = vst.msk [vmem:[%s3634_s14 + $0x28] sm:$0xff] %vm351_vm1, %v2751_v31  ;;  %v2737_v38 = vadd.f32 %v2721_v29, %v2705_v32  ;;  %v2687_v39 = vmul.f32 %v3330_v37, %v4423_v51  ;;  %v2619_v40 = vpop.f32.mrb[15].mxu1 }
 0x556   : > { %2766 = vst.msk [vmem:[%s3634_s14 + $0x20] sm:$0xff] %vm351_vm1, %v2750_v35  ;;  %v2736_v0 = vadd.f32 %v2720_v33, %v2704_v36  ;;  %v2686_v41 = vmul.f32 %v4423_v51, %v2619_v40 }
 0x557   : > { %v2753_v42 = vmax.f32 %v2737_v38, 0.0  ;;  %v2707_v43 = vadd.f32 %v4428_v3, %v2687_v39 }
 0x558   : > { %v2752_v45 = vmax.f32 %v2736_v0, 0.0  ;;  %v2706_v47 = vadd.f32 %v4428_v3, %v2686_v41  ;;  %v3333_v48 = vpop.f32.mrb[16].mxu1 }
 0x559   : > { %2769 = vst.msk [vmem:[%s3634_s14 + $0x38] sm:$0xff] %vm351_vm1, %v2753_v42  ;;  %v2739_v49 = vadd.f32 %v2723_v1, %v2707_v43  ;;  %v2689_v50 = vmul.f32 %v3333_v48, %v4423_v51  ;;  %v2629_v2 = vpop.f32.mrb[17].mxu1 }
 0x55a   : > { %2768 = vst.msk [vmem:[%s3634_s14 + $0x30] sm:$0xff] %vm351_vm1, %v2752_v45  ;;  %v2738_v34 = vadd.f32 %v2722_v44, %v2706_v47  ;;  %v2688_v52 = vmul.f32 %v4423_v51, %v2629_v2 }
 0x55b   : > { %v2755_v53 = vmax.f32 %v2739_v49, 0.0  ;;  %v2709_v54 = vadd.f32 %v4428_v3, %v2689_v50 }
 0x55c   : > { %v2754_v56 = vmax.f32 %v2738_v34, 0.0  ;;  %v2708_v59 = vadd.f32 %v4428_v3, %v2688_v52  ;;  %v3336_v61 = vpop.f32.mrb[18].mxu1 }
 0x55d   : > { %2771 = vst.msk [vmem:[%s3634_s14 + $0x48] sm:$0xff] %vm351_vm1, %v2755_v53  ;;  %v2741_v62 = vadd.f32 %v2725_v46, %v2709_v54  ;;  %v2691_v63 = vmul.f32 %v3336_v61, %v4423_v51  ;;  %v2639_v8 = vpop.f32.mrb[19].mxu1 }
 0x55e   : > { %2770 = vst.msk [vmem:[%s3634_s14 + $0x40] sm:$0xff] %vm351_vm1, %v2754_v56  ;;  %v2740_v9 = vadd.f32 %v2724_v55, %v2708_v59  ;;  %v2690_v11 = vmul.f32 %v4423_v51, %v2639_v8 }
 0x55f   : > { %v2757_v4 = vmax.f32 %v2741_v62, 0.0  ;;  %v2711_v12 = vadd.f32 %v4428_v3, %v2691_v63 }
 0x560   : > { %v2756_v5 = vmax.f32 %v2740_v9, 0.0  ;;  %v2710_v57 = vadd.f32 %v4428_v3, %v2690_v11  ;;  %v3339_v17 = vpop.f32.mrb[20].mxu1 }
 0x561   : > { %2773 = vst.msk [vmem:[%s3634_s14 + $0x58] sm:$0xff] %vm351_vm1, %v2757_v4  ;;  %v2743_v6 = vadd.f32 %v2727_v10, %v2711_v12  ;;  %v2693_v18 = vmul.f32 %v3339_v17, %v4423_v51  ;;  %v2649_v19 = vpop.f32.mrb[21].mxu1 }
 0x562   : > { %2772 = vst.msk [vmem:[%s3634_s14 + $0x50] sm:$0xff] %vm351_vm1, %v2756_v5  ;;  %v2742_v60 = vadd.f32 %v2726_v16, %v2710_v57  ;;  %v2692_v21 = vmul.f32 %v4423_v51, %v2649_v19 }
 0x563   : > { %v2759_v7 = vmax.f32 %v2743_v6, 0.0  ;;  %v2713_v22 = vadd.f32 %v4428_v3, %v2693_v18 }
 0x564   : > { %v2758_v58 = vmax.f32 %v2742_v60, 0.0  ;;  %v2712_v24 = vadd.f32 %v4428_v3, %v2692_v21 }
 0x565   : > { %2775 = vst.msk [vmem:[%s3634_s14 + $0x68] sm:$0xff] %vm351_vm1, %v2759_v7  ;;  %v2745_v13 = vadd.f32 %v2729_v20, %v2713_v22 }
 0x566   : > { %2774 = vst.msk [vmem:[%s3634_s14 + $0x60] sm:$0xff] %vm351_vm1, %v2758_v58  ;;  %v2744_v14 = vadd.f32 %v2728_v23, %v2712_v24 }
 0x567   : > { %v2761_v15 = vmax.f32 %v2745_v13, 0.0 }
 0x568   : > { %v2760_v25 = vmax.f32 %v2744_v14, 0.0 }
 0x569   : > { %2777 = vst.msk [vmem:[%s3634_s14 + $0x78] sm:$0xff] %vm351_vm1, %v2761_v15 }
 0x56a   : > { %2776 = vst.msk [vmem:[%s3634_s14 + $0x70] sm:$0xff] %vm351_vm1, %v2760_v25 }
 0x56b PF: > { %s15_s22 = sadd.s32 1, %s3539_s22   ;;  %s4533_s18 = smov %s3531_s20 }
 0x56c   : > { %p12_p11 = scmp.ge.s32.totalorder %s15_s22, 6   ;;  %s4534_s19 = smov %s3535_s21 }
 0x56d   : > { %s4535_s20 = smov %s4538_s23  ;;  %s4536_s21 = smov %s4542_s24 }
 0x56e   :  { %14 = sbr.rel (!%p12_p11) target bundleno = 3 (0x3), region = 106 }

</bundles_post_ra>
